<compile_context>
chip_gen: v6e
topology: v6e:2x2x1
jax: 0.10.0
libtpu: 0.0.40
codegen_flags: <defaults>
</compile_context>

<pallas_src>
import numpy as np

import jax
import jax.numpy as jnp
from jax.experimental import pallas as pl
from jax.experimental.pallas import tpu as pltpu

LANE = 128  # lane width; value head / output are padded to this for dense stores


def _round8(n):
    return ((int(n) + 7) // 8) * 8


# ----------------------------- geometry & trace-time constants -----------------------------

def _geometry(B, C, H, W):
    hp, wp = H - 1, W - 1          # conv1 output grid
    ho, wo = H - 2, W - 2          # conv2 output grid
    n_rows1 = B * hp * wp          # conv1 rows (batch-major, row = b*hp*wp + i*wp + j)
    L = n_rows1 - wp - 1           # rows needed to cover every valid conv2 output row
    L_pad = _round8(L)
    R1p = max(_round8(n_rows1), wp + 1 + L_pad)   # padded conv1 rows (covers all shifts)
    return dict(B=B, C=C, H=H, W=W, hp=hp, wp=wp, ho=ho, wo=wo,
                n_rows1=n_rows1, L_pad=L_pad, R1p=R1p)


def _patch_indices(state):
    """im2col on the raw int32 state: (B, C, H, W) -> (B*(H-1)*(W-1), C*4) pixel ids."""
    b, c, h, w = state.shape
    cols = []
    for ci in range(c):
        for di in (0, 1):
            for dj in (0, 1):
                cols.append(state[:, ci, di:di + h - 1, dj:dj + w - 1].reshape(-1))
    return jnp.stack(cols, axis=1).astype(jnp.int32)


def _pool_mask_np(g):
    """(L_pad, B) 1/0 mask: row r of the conv1 grid is a valid conv2 token of batch b."""
    m = np.zeros((g["L_pad"], g["B"]), np.float32)
    blk = g["hp"] * g["wp"]
    for r in range(min(g["L_pad"], g["n_rows1"])):
        b, rem = divmod(r, blk)
        i, j = divmod(rem, g["wp"])
        if i < g["ho"] and j < g["wo"]:
            m[r, b] = 1.0
    return m


def _pos_feat_np(g):
    """(L_pad, 2) positional coordinates (x=row, y=col on the conv2 grid), 0 on invalid rows."""
    xs = np.linspace(-1.0, 1.0, g["ho"], dtype=np.float32)
    ys = np.linspace(-1.0, 1.0, g["wo"], dtype=np.float32)
    pf = np.zeros((g["L_pad"], 2), np.float32)
    blk = g["hp"] * g["wp"]
    for r in range(min(g["L_pad"], g["n_rows1"])):
        b, rem = divmod(r, blk)
        i, j = divmod(rem, g["wp"])
        if i < g["ho"] and j < g["wo"]:
            pf[r, 0], pf[r, 1] = xs[i], ys[j]
    return pf


# ----------------------------- slab packing -----------------------------

def _pack_slab(parts):
    """Pack [(name, 2-D array)] into one (rows, 128) f32 slab with 8-aligned row offsets."""
    layout, chunks, row = {}, [], 0
    for name, arr in parts:
        arr = jnp.asarray(arr, jnp.float32)
        r, c = arr.shape
        rp = _round8(r)
        layout[name] = (row, r, c)
        chunks.append(jnp.pad(arr, ((0, rp - r), (0, LANE - c))))
        row += rp
    return jnp.concatenate(chunks, axis=0), layout


def _embed_patches(embed, sp, n_rows_pad):
    """Hoisted embedding gather: (n_rows1, C*4) ids -> (R1p, C*4*n_dim) dense f32."""
    n_rows1, n_cols = sp.shape
    n_dim = embed.shape[1]
    ep = jnp.take(embed, sp.reshape(-1), axis=0).reshape(n_rows1, n_cols * n_dim)
    return jnp.pad(ep, ((0, n_rows_pad - n_rows1), (0, 0)))


def _critic_parts(params, sp, g):
    """Per-critic parts list: reformatted weights + folded constants + gathered patches."""
    embed = params["embed"]
    n_dim = embed.shape[1]
    C = g["C"]

    w1 = params["conv1_w"]                               # (nk//2, C*n_dim, 2, 2)
    nk2 = w1.shape[0]
    # im2col weight, column order (c, di, dj, d) matching _patch_indices / _embed_patches.
    w1i = jnp.transpose(w1.reshape(nk2, C, n_dim, 2, 2), (1, 3, 4, 2, 0)
                        ).reshape(C * 4 * n_dim, nk2)

    w2 = params["conv2_w"]                               # (nk, nk//2, 2, 2)
    nk = w2.shape[0]
    # Fused conv2 weight: lane block p = di*2+dj holds w2[:, :, di, dj].T.
    w2all = jnp.transpose(w2, (2, 3, 1, 0)).reshape(4, nk2, nk
                          ).transpose(1, 0, 2).reshape(nk2, 4 * nk)

    pjk, pjp = params["proj_w"][:-2], params["proj_w"][-2:]
    posb = jnp.asarray(_pos_feat_np(g)) @ pjp + params["proj_b"]   # (L_pad, nf) folded bias

    x = _embed_patches(embed, sp, g["R1p"])                        # (R1p, C*4*n_dim)
    pmask = jnp.asarray(_pool_mask_np(g))                          # (L_pad, B)

    lw = jnp.pad(params["lin_w"], ((0, 0), (0, LANE - params["lin_w"].shape[1])))
    lb = jnp.pad(params["lin_b"], ((0, 0), (0, LANE - params["lin_b"].shape[1])))

    parts = [("x", x), ("pmask", pmask),
             ("w1i", w1i), ("c1b", params["conv1_b"]),
             ("w2all", w2all), ("c2b", params["conv2_b"]),
             ("pjk", pjk), ("posb", posb)]
    for l in range(params["pff_w1"].shape[0]):
        parts += [("fw1_%d" % l, params["pff_w1"][l]), ("fb1_%d" % l, params["pff_b1"][l]),
                  ("fw2_%d" % l, params["pff_w2"][l]), ("fb2_%d" % l, params["pff_b2"][l])]
    for l in range(params["res_w1"].shape[0]):
        parts += [("rw1_%d" % l, params["res_w1"][l]), ("rb1_%d" % l, params["res_b1"][l]),
                  ("rw2_%d" % l, params["res_w2"][l]), ("rb2_%d" % l, params["res_b2"][l])]
    parts += [("lw", lw), ("lb", lb)]
    return parts


# ----------------------------- fused Pallas kernel -----------------------------

def _make_kernel(layout, dims):
    nk, nf = dims["nk"], dims["nf"]
    nc, nl = dims["nc"], dims["nl"]
    L_pad, wp = dims["L_pad"], dims["wp"]
    B, BP = dims["B"], dims["BP"]

    def kernel(w_ref, o_ref, y_sc):
        def rd(name):
            off, r, c = layout[name]
            return w_ref[pl.ds(off, r), pl.ds(0, c)]

        # conv1 (embedding gather hoisted to the wrapper): one dense matmul + ReLU.
        h1 = jnp.maximum(
            jnp.dot(rd("x"), rd("w1i"), preferred_element_type=jnp.float32) + rd("c1b"),
            0.0)                                                        # (R1p, nk//2)

        # conv2: one fused matmul over all 4 taps, then 4 static shifted-slice adds.
        y_sc[...] = jnp.dot(h1, rd("w2all"), preferred_element_type=jnp.float32)
        shifts = (0, 1, wp, wp + 1)
        acc2 = y_sc[pl.ds(shifts[0], L_pad), pl.ds(0, nk)]
        for p in range(1, 4):
            acc2 = acc2 + y_sc[pl.ds(shifts[p], L_pad), pl.ds(p * nk, nk)]
        h2 = jnp.maximum(acc2 + rd("c2b"), 0.0)                         # (L_pad, nk)

        # projection; positional part pre-folded into the per-critic "posb" constant.
        h = jnp.dot(h2, rd("pjk"), preferred_element_type=jnp.float32) + rd("posb")

        # PositionwiseFeedForward stack: h = w2(relu(w1(h))).
        for l in range(nc):
            a = jnp.maximum(
                jnp.dot(h, rd("fw1_%d" % l), preferred_element_type=jnp.float32)
                + rd("fb1_%d" % l), 0.0)
            h = jnp.dot(a, rd("fw2_%d" % l), preferred_element_type=jnp.float32) \
                + rd("fb2_%d" % l)

        # FeaturewiseMaxPool: masked segment-max over valid tokens of each batch row.
        pmask = rd("pmask")                                             # (L_pad, B)
        neg = jnp.float32(-3.0e38)
        rows = []
        for b in range(B):
            m = pmask[:, b:b + 1] > 0.5
            rows.append(jnp.max(jnp.where(m, h, neg), axis=0, keepdims=True))
        rows += [jnp.zeros((1, nf), jnp.float32)] * (BP - B)
        gfeat = jnp.concatenate(rows, axis=0)                           # (BP, nf)

        # Residual layers + value head (lane-padded weights -> dense (BP,128) store).
        for l in range(nl):
            a = jnp.maximum(
                jnp.dot(gfeat, rd("rw1_%d" % l), preferred_element_type=jnp.float32)
                + rd("rb1_%d" % l), 0.0)
            gfeat = gfeat + jnp.dot(a, rd("rw2_%d" % l),
                                    preferred_element_type=jnp.float32) + rd("rb2_%d" % l)
        v = jnp.dot(gfeat, rd("lw"), preferred_element_type=jnp.float32) + rd("lb")
        o_ref[...] = v.astype(o_ref.dtype)                              # (BP, 128)

    return kernel


# ----------------------------- pallas_call wrapper -----------------------------

def _fused_critic_call(state, params_list):
    B, C, H, W = state.shape
    g = _geometry(B, C, H, W)
    sp = _patch_indices(state)

    slabs, layout = [], None
    for p in params_list:
        slab, layout = _pack_slab(_critic_parts(p, sp, g))
        slabs.append(slab)
    slab_all = jnp.stack(slabs, axis=0)                  # (n_crit, slab_rows, 128)
    n_crit, slab_rows, _ = slab_all.shape

    BP = max(8, _round8(B))
    dims = dict(nk=params_list[0]["conv2_w"].shape[0],
                nf=params_list[0]["proj_w"].shape[1],
                nc=params_list[0]["pff_w1"].shape[0],
                nl=params_list[0]["res_w1"].shape[0],
                L_pad=g["L_pad"], wp=g["wp"], B=B, BP=BP)
    kernel = _make_kernel(layout, dims)

    out = pl.pallas_call(
        kernel,
        out_shape=jax.ShapeDtypeStruct((n_crit, BP, LANE), jnp.float32),
        grid=(n_crit,),
        in_specs=[pl.BlockSpec((None, slab_rows, LANE), lambda c: (c, 0, 0))],
        out_specs=pl.BlockSpec((None, BP, LANE), lambda c: (c, 0, 0)),
        scratch_shapes=[pltpu.VMEM((g["R1p"], 4 * dims["nk"]), jnp.float32)],
        compiler_params=pltpu.CompilerParams(
            dimension_semantics=("parallel",),            # v7x: critics on both TCs
            vmem_limit_bytes=32 * 1024 * 1024),
    )(slab_all)
    return out[:, :B, :1]                                 # (n_crit, B, 1)


# ----------------------------- ControlBasicCritic / ControlCritic forward -----------------------------

def control_basic_critic_forward(state, params):
    return _fused_critic_call(state, [params])[0]                     # (B, 1)


def control_critic_forward(state, params1, params2=None, twin=True, target=False):
    if not twin:
        return control_basic_critic_forward(state, params1)
    v = _fused_critic_call(state, [params1, params2])   # one pallas_call for BOTH critics
    v1, v2 = v[0], v[1]
    if target:
        return jnp.minimum(v1, v2)
    return v1, v2


# ----------------------------- deterministic parameter init -----------------------------

def _uniform(key, shape, bound):
    return jax.random.uniform(key, shape, jnp.float32, -bound, bound)


def make_critic_params(key, cfg):
    c_in, nk = cfg["in_channels"], cfg["n_kernels"]
    vocab, nd = cfg["vocab_size"], cfg["n_dim"]
    nf, hd = cfg["n_features"], cfg["hidden_dim"]
    nc, nl = cfg["n_control_modules"], cfg["n_linears"]
    assert nk % 2 == 0
    keys = iter(jax.random.split(key, 64))
    p = {}
    p["embed"] = jax.random.normal(next(keys), (vocab, nd), jnp.float32)
    fan = c_in * nd * 4
    p["conv1_w"] = _uniform(next(keys), (nk // 2, c_in * nd, 2, 2), 1.0 / fan ** 0.5)
    p["conv1_b"] = _uniform(next(keys), (1, nk // 2), 1.0 / fan ** 0.5)
    fan = (nk // 2) * 4
    p["conv2_w"] = _uniform(next(keys), (nk, nk // 2, 2, 2), 1.0 / fan ** 0.5)
    p["conv2_b"] = _uniform(next(keys), (1, nk), 1.0 / fan ** 0.5)
    fan = nk + 2
    p["proj_w"] = _uniform(next(keys), (nk + 2, nf), 1.0 / fan ** 0.5)
    p["proj_b"] = _uniform(next(keys), (1, nf), 1.0 / fan ** 0.5)
    p["pff_w1"] = jnp.stack([_uniform(next(keys), (nf, hd), 1.0 / nf ** 0.5) for _ in range(nc)])
    p["pff_b1"] = jnp.stack([_uniform(next(keys), (1, hd), 1.0 / nf ** 0.5) for _ in range(nc)])
    p["pff_w2"] = jnp.stack([_uniform(next(keys), (hd, nf), 1.0 / hd ** 0.5) for _ in range(nc)])
    p["pff_b2"] = jnp.stack([_uniform(next(keys), (1, nf), 1.0 / hd ** 0.5) for _ in range(nc)])
    p["res_w1"] = jnp.stack([_uniform(next(keys), (nf, hd), 1.0 / nf ** 0.5) for _ in range(nl)])
    p["res_b1"] = jnp.stack([_uniform(next(keys), (1, hd), 1.0 / nf ** 0.5) for _ in range(nl)])
    p["res_w2"] = jnp.stack([_uniform(next(keys), (hd, nf), 1.0 / hd ** 0.5) for _ in range(nl)])
    p["res_b2"] = jnp.stack([_uniform(next(keys), (1, nf), 1.0 / hd ** 0.5) for _ in range(nl)])
    p["lin_w"] = _uniform(next(keys), (nf, 1), 1.0 / nf ** 0.5)
    p["lin_b"] = _uniform(next(keys), (1, 1), 1.0 / nf ** 0.5)
    return p


# ----------------------------- main -----------------------------

if __name__ == "__main__":
    cfg = dict(in_channels=1, n_kernels=8, vocab_size=117, n_dim=3,
               n_features=64, hidden_dim=32, n_control_modules=2, n_linears=2)
    key = jax.random.PRNGKey(0)
    k_state, k1, k2 = jax.random.split(key, 3)

    B, H, W = 2, 8, 8
    state = jax.random.randint(
        k_state, (B, cfg["in_channels"], H, W), 0, cfg["vocab_size"], dtype=jnp.int32)

    params1 = make_critic_params(k1, cfg)  # twin critic net1
    params2 = make_critic_params(k2, cfg)  # twin critic net2

    fwd = jax.jit(control_critic_forward, static_argnames=("twin", "target"))
    v1, v2 = fwd(state, params1, params2, twin=True, target=False)
    jax.block_until_ready((v1, v2))
    assert v1.shape == (B, 1) and v2.shape == (B, 1)
    assert v1.dtype == jnp.float32 and v2.dtype == jnp.float32

    # Also exercise the target=True path (min of the two critics).
    v_min = fwd(state, params1, params2, twin=True, target=True)
    jax.block_until_ready(v_min)
    assert v_min.shape == (B, 1)

    print("KERNEL_OK")
</pallas_src>

<mosaic_0001>
module attributes {stable_mosaic.version = 11 : i64} {
  func.func @kernel(%arg0: i32, %arg1: memref<1x864x128xf32, #tpu.memory_space<vmem>>, %arg2: memref<1x8x128xf32, #tpu.memory_space<vmem>>, %arg3: memref<104x32xf32, #tpu.memory_space<vmem>>) attributes {dimension_semantics = [#tpu.dimension_semantics<parallel>], iteration_bounds = array<i64: 2>, scalar_prefetch = 0 : i64, scratch_operands = 1 : i64, tpu.core_type = #tpu.core_type<tc>, window_params = [{transform_indices = @transform_0, window_bounds = array<i64: 1, 864, 128>}, {transform_indices = @transform_1, window_bounds = array<i64: 1, 8, 128>}]} {
    %c0 = arith.constant 0 : index
    %c0_0 = arith.constant 0 : index
    %c0_1 = arith.constant 0 : index
    %0 = vector.load %arg1[%c0, %c0_0, %c0_1] : memref<1x864x128xf32, #tpu.memory_space<vmem>>, vector<1x104x12xf32>
    %1 = vector.shape_cast %0 : vector<1x104x12xf32> to vector<104x12xf32>
    %c0_2 = arith.constant 0 : index
    %c200 = arith.constant 200 : index
    %c0_3 = arith.constant 0 : index
    %2 = vector.load %arg1[%c0_2, %c200, %c0_3] : memref<1x864x128xf32, #tpu.memory_space<vmem>>, vector<1x12x4xf32>
    %3 = vector.shape_cast %2 : vector<1x12x4xf32> to vector<12x4xf32>
    %cst = arith.constant dense<0.000000e+00> : vector<104x4xf32>
    %4 = tpu.matmul %1, %3, %cst {dimension_numbers = #tpu.dot_dimension_numbers<[1], [0], [0], [1], [0, 0, 1, 1], [], []>} : vector<104x12xf32>, vector<12x4xf32>, vector<104x4xf32> -> vector<104x4xf32>
    %c0_4 = arith.constant 0 : index
    %c216 = arith.constant 216 : index
    %c0_5 = arith.constant 0 : index
    %5 = vector.load %arg1[%c0_4, %c216, %c0_5] : memref<1x864x128xf32, #tpu.memory_space<vmem>>, vector<1x1x4xf32>
    %6 = vector.shape_cast %5 : vector<1x1x4xf32> to vector<1x4xf32>
    %7 = vector.broadcast %6 : vector<1x4xf32> to vector<104x4xf32>
    %8 = arith.addf %4, %7 : vector<104x4xf32>
    %cst_6 = arith.constant 0.000000e+00 : f32
    %9 = vector.broadcast %cst_6 : f32 to vector<104x4xf32>
    %10 = arith.maximumf %8, %9 : vector<104x4xf32>
    %c0_7 = arith.constant 0 : index
    %c224 = arith.constant 224 : index
    %c0_8 = arith.constant 0 : index
    %11 = vector.load %arg1[%c0_7, %c224, %c0_8] : memref<1x864x128xf32, #tpu.memory_space<vmem>>, vector<1x4x32xf32>
    %12 = vector.shape_cast %11 : vector<1x4x32xf32> to vector<4x32xf32>
    %cst_9 = arith.constant dense<0.000000e+00> : vector<104x32xf32>
    %13 = tpu.matmul %10, %12, %cst_9 {dimension_numbers = #tpu.dot_dimension_numbers<[1], [0], [0], [1], [0, 0, 1, 1], [], []>} : vector<104x4xf32>, vector<4x32xf32>, vector<104x32xf32> -> vector<104x32xf32>
    %c0_10 = arith.constant 0 : index
    %c0_11 = arith.constant 0 : index
    %14 = vector.load %arg3[%c0_10, %c0_11] : memref<104x32xf32, #tpu.memory_space<vmem>>, vector<104x32xf32>
    tpu.vector_store %arg3[%c0_10, %c0_11], %13 {strides = array<i32>} : memref<104x32xf32, #tpu.memory_space<vmem>>, vector<104x32xf32>,
    %c0_12 = arith.constant 0 : index
    %c0_13 = arith.constant 0 : index
    %15 = vector.load %arg3[%c0_12, %c0_13] : memref<104x32xf32, #tpu.memory_space<vmem>>, vector<96x8xf32>
    %c1 = arith.constant 1 : index
    %c8 = arith.constant 8 : index
    %16 = vector.load %arg3[%c1, %c8] : memref<104x32xf32, #tpu.memory_space<vmem>>, vector<96x8xf32>
    %17 = arith.addf %15, %16 : vector<96x8xf32>
    %c7 = arith.constant 7 : index
    %c16 = arith.constant 16 : index
    %18 = vector.load %arg3[%c7, %c16] : memref<104x32xf32, #tpu.memory_space<vmem>>, vector<96x8xf32>
    %19 = arith.addf %17, %18 : vector<96x8xf32>
    %c8_14 = arith.constant 8 : index
    %c24 = arith.constant 24 : index
    %20 = vector.load %arg3[%c8_14, %c24] : memref<104x32xf32, #tpu.memory_space<vmem>>, vector<96x8xf32>
    %21 = arith.addf %19, %20 : vector<96x8xf32>
    %c0_15 = arith.constant 0 : index
    %c232 = arith.constant 232 : index
    %c0_16 = arith.constant 0 : index
    %22 = vector.load %arg1[%c0_15, %c232, %c0_16] : memref<1x864x128xf32, #tpu.memory_space<vmem>>, vector<1x1x8xf32>
    %23 = vector.shape_cast %22 : vector<1x1x8xf32> to vector<1x8xf32>
    %24 = vector.broadcast %23 : vector<1x8xf32> to vector<96x8xf32>
    %25 = arith.addf %21, %24 : vector<96x8xf32>
    %cst_17 = arith.constant 0.000000e+00 : f32
    %26 = vector.broadcast %cst_17 : f32 to vector<96x8xf32>
    %27 = arith.maximumf %25, %26 : vector<96x8xf32>
    %c0_18 = arith.constant 0 : index
    %c240 = arith.constant 240 : index
    %c0_19 = arith.constant 0 : index
    %28 = vector.load %arg1[%c0_18, %c240, %c0_19] : memref<1x864x128xf32, #tpu.memory_space<vmem>>, vector<1x8x64xf32>
    %29 = vector.shape_cast %28 : vector<1x8x64xf32> to vector<8x64xf32>
    %cst_20 = arith.constant dense<0.000000e+00> : vector<96x64xf32>
    %30 = tpu.matmul %27, %29, %cst_20 {dimension_numbers = #tpu.dot_dimension_numbers<[1], [0], [0], [1], [0, 0, 1, 1], [], []>} : vector<96x8xf32>, vector<8x64xf32>, vector<96x64xf32> -> vector<96x64xf32>
    %c0_21 = arith.constant 0 : index
    %c248 = arith.constant 248 : index
    %c0_22 = arith.constant 0 : index
    %31 = vector.load %arg1[%c0_21, %c248, %c0_22] : memref<1x864x128xf32, #tpu.memory_space<vmem>>, vector<1x96x64xf32>
    %32 = vector.shape_cast %31 : vector<1x96x64xf32> to vector<96x64xf32>
    %33 = arith.addf %30, %32 : vector<96x64xf32>
    %c0_23 = arith.constant 0 : index
    %c344 = arith.constant 344 : index
    %c0_24 = arith.constant 0 : index
    %34 = vector.load %arg1[%c0_23, %c344, %c0_24] : memref<1x864x128xf32, #tpu.memory_space<vmem>>, vector<1x64x32xf32>
    %35 = vector.shape_cast %34 : vector<1x64x32xf32> to vector<64x32xf32>
    %cst_25 = arith.constant dense<0.000000e+00> : vector<96x32xf32>
    %36 = tpu.matmul %33, %35, %cst_25 {dimension_numbers = #tpu.dot_dimension_numbers<[1], [0], [0], [1], [0, 0, 1, 1], [], []>} : vector<96x64xf32>, vector<64x32xf32>, vector<96x32xf32> -> vector<96x32xf32>
    %c0_26 = arith.constant 0 : index
    %c408 = arith.constant 408 : index
    %c0_27 = arith.constant 0 : index
    %37 = vector.load %arg1[%c0_26, %c408, %c0_27] : memref<1x864x128xf32, #tpu.memory_space<vmem>>, vector<1x1x32xf32>
    %38 = vector.shape_cast %37 : vector<1x1x32xf32> to vector<1x32xf32>
    %39 = vector.broadcast %38 : vector<1x32xf32> to vector<96x32xf32>
    %40 = arith.addf %36, %39 : vector<96x32xf32>
    %cst_28 = arith.constant 0.000000e+00 : f32
    %41 = vector.broadcast %cst_28 : f32 to vector<96x32xf32>
    %42 = arith.maximumf %40, %41 : vector<96x32xf32>
    %c0_29 = arith.constant 0 : index
    %c416 = arith.constant 416 : index
    %c0_30 = arith.constant 0 : index
    %43 = vector.load %arg1[%c0_29, %c416, %c0_30] : memref<1x864x128xf32, #tpu.memory_space<vmem>>, vector<1x32x64xf32>
    %44 = vector.shape_cast %43 : vector<1x32x64xf32> to vector<32x64xf32>
    %cst_31 = arith.constant dense<0.000000e+00> : vector<96x64xf32>
    %45 = tpu.matmul %42, %44, %cst_31 {dimension_numbers = #tpu.dot_dimension_numbers<[1], [0], [0], [1], [0, 0, 1, 1], [], []>} : vector<96x32xf32>, vector<32x64xf32>, vector<96x64xf32> -> vector<96x64xf32>
    %c0_32 = arith.constant 0 : index
    %c448 = arith.constant 448 : index
    %c0_33 = arith.constant 0 : index
    %46 = vector.load %arg1[%c0_32, %c448, %c0_33] : memref<1x864x128xf32, #tpu.memory_space<vmem>>, vector<1x1x64xf32>
    %47 = vector.shape_cast %46 : vector<1x1x64xf32> to vector<1x64xf32>
    %48 = vector.broadcast %47 : vector<1x64xf32> to vector<96x64xf32>
    %49 = arith.addf %45, %48 : vector<96x64xf32>
    %c0_34 = arith.constant 0 : index
    %c456 = arith.constant 456 : index
    %c0_35 = arith.constant 0 : index
    %50 = vector.load %arg1[%c0_34, %c456, %c0_35] : memref<1x864x128xf32, #tpu.memory_space<vmem>>, vector<1x64x32xf32>
    %51 = vector.shape_cast %50 : vector<1x64x32xf32> to vector<64x32xf32>
    %cst_36 = arith.constant dense<0.000000e+00> : vector<96x32xf32>
    %52 = tpu.matmul %49, %51, %cst_36 {dimension_numbers = #tpu.dot_dimension_numbers<[1], [0], [0], [1], [0, 0, 1, 1], [], []>} : vector<96x64xf32>, vector<64x32xf32>, vector<96x32xf32> -> vector<96x32xf32>
    %c0_37 = arith.constant 0 : index
    %c520 = arith.constant 520 : index
    %c0_38 = arith.constant 0 : index
    %53 = vector.load %arg1[%c0_37, %c520, %c0_38] : memref<1x864x128xf32, #tpu.memory_space<vmem>>, vector<1x1x32xf32>
    %54 = vector.shape_cast %53 : vector<1x1x32xf32> to vector<1x32xf32>
    %55 = vector.broadcast %54 : vector<1x32xf32> to vector<96x32xf32>
    %56 = arith.addf %52, %55 : vector<96x32xf32>
    %cst_39 = arith.constant 0.000000e+00 : f32
    %57 = vector.broadcast %cst_39 : f32 to vector<96x32xf32>
    %58 = arith.maximumf %56, %57 : vector<96x32xf32>
    %c0_40 = arith.constant 0 : index
    %c528 = arith.constant 528 : index
    %c0_41 = arith.constant 0 : index
    %59 = vector.load %arg1[%c0_40, %c528, %c0_41] : memref<1x864x128xf32, #tpu.memory_space<vmem>>, vector<1x32x64xf32>
    %60 = vector.shape_cast %59 : vector<1x32x64xf32> to vector<32x64xf32>
    %cst_42 = arith.constant dense<0.000000e+00> : vector<96x64xf32>
    %61 = tpu.matmul %58, %60, %cst_42 {dimension_numbers = #tpu.dot_dimension_numbers<[1], [0], [0], [1], [0, 0, 1, 1], [], []>} : vector<96x32xf32>, vector<32x64xf32>, vector<96x64xf32> -> vector<96x64xf32>
    %c0_43 = arith.constant 0 : index
    %c560 = arith.constant 560 : index
    %c0_44 = arith.constant 0 : index
    %62 = vector.load %arg1[%c0_43, %c560, %c0_44] : memref<1x864x128xf32, #tpu.memory_space<vmem>>, vector<1x1x64xf32>
    %63 = vector.shape_cast %62 : vector<1x1x64xf32> to vector<1x64xf32>
    %64 = vector.broadcast %63 : vector<1x64xf32> to vector<96x64xf32>
    %65 = arith.addf %61, %64 : vector<96x64xf32>
    %c0_45 = arith.constant 0 : index
    %c104 = arith.constant 104 : index
    %c0_46 = arith.constant 0 : index
    %66 = vector.load %arg1[%c0_45, %c104, %c0_46] : memref<1x864x128xf32, #tpu.memory_space<vmem>>, vector<1x96x2xf32>
    %67 = vector.shape_cast %66 : vector<1x96x2xf32> to vector<96x2xf32>
    %68 = vector.extract_strided_slice %67 {offsets = [0, 0], sizes = [96, 1], strides = [1, 1]} : vector<96x2xf32> to vector<96x1xf32>
    %cst_47 = arith.constant 5.000000e-01 : f32
    %69 = vector.broadcast %cst_47 : f32 to vector<96x1xf32>
    %70 = arith.cmpf ogt, %68, %69 : vector<96x1xf32>
    %cst_48 = arith.constant -3.000000e+38 : f32
    %71 = vector.shape_cast %70 : vector<96x1xi1> to vector<96x1xi1>
    %72 = vector.broadcast %71 : vector<96x1xi1> to vector<96x64xi1>
    %73 = vector.broadcast %cst_48 : f32 to vector<96x64xf32>
    %74 = arith.select %72, %65, %73 : vector<96x64xi1>, vector<96x64xf32>
    %cst_49 = arith.constant dense<0xFF800000> : vector<64xf32>
    %75 = vector.multi_reduction <maximumf>, %74, %cst_49 [0] : vector<96x64xf32> to vector<64xf32>
    %76 = vector.shape_cast %75 : vector<64xf32> to vector<1x64xf32>
    %77 = vector.extract_strided_slice %67 {offsets = [0, 1], sizes = [96, 1], strides = [1, 1]} : vector<96x2xf32> to vector<96x1xf32>
    %cst_50 = arith.constant 5.000000e-01 : f32
    %78 = vector.broadcast %cst_50 : f32 to vector<96x1xf32>
    %79 = arith.cmpf ogt, %77, %78 : vector<96x1xf32>
    %cst_51 = arith.constant -3.000000e+38 : f32
    %80 = vector.shape_cast %79 : vector<96x1xi1> to vector<96x1xi1>
    %81 = vector.broadcast %80 : vector<96x1xi1> to vector<96x64xi1>
    %82 = vector.broadcast %cst_51 : f32 to vector<96x64xf32>
    %83 = arith.select %81, %65, %82 : vector<96x64xi1>, vector<96x64xf32>
    %cst_52 = arith.constant dense<0xFF800000> : vector<64xf32>
    %84 = vector.multi_reduction <maximumf>, %83, %cst_52 [0] : vector<96x64xf32> to vector<64xf32>
    %85 = vector.shape_cast %84 : vector<64xf32> to vector<1x64xf32>
    %cst_53 = arith.constant 0.000000e+00 : f32
    %86 = vector.broadcast %cst_53 : f32 to vector<1x64xf32>
    %87 = tpu.concatenate %76, %85, %86, %86, %86, %86, %86, %86 in 0 : vector<1x64xf32>, vector<1x64xf32>, vector<1x64xf32>, vector<1x64xf32>, vector<1x64xf32>, vector<1x64xf32>, vector<1x64xf32>, vector<1x64xf32> -> vector<8x64xf32>
    %c0_54 = arith.constant 0 : index
    %c568 = arith.constant 568 : index
    %c0_55 = arith.constant 0 : index
    %88 = vector.load %arg1[%c0_54, %c568, %c0_55] : memref<1x864x128xf32, #tpu.memory_space<vmem>>, vector<1x64x32xf32>
    %89 = vector.shape_cast %88 : vector<1x64x32xf32> to vector<64x32xf32>
    %cst_56 = arith.constant dense<0.000000e+00> : vector<8x32xf32>
    %90 = tpu.matmul %87, %89, %cst_56 {dimension_numbers = #tpu.dot_dimension_numbers<[1], [0], [0], [1], [0, 0, 1, 1], [], []>} : vector<8x64xf32>, vector<64x32xf32>, vector<8x32xf32> -> vector<8x32xf32>
    %c0_57 = arith.constant 0 : index
    %c632 = arith.constant 632 : index
    %c0_58 = arith.constant 0 : index
    %91 = vector.load %arg1[%c0_57, %c632, %c0_58] : memref<1x864x128xf32, #tpu.memory_space<vmem>>, vector<1x1x32xf32>
    %92 = vector.shape_cast %91 : vector<1x1x32xf32> to vector<1x32xf32>
    %93 = vector.broadcast %92 : vector<1x32xf32> to vector<8x32xf32>
    %94 = arith.addf %90, %93 : vector<8x32xf32>
    %cst_59 = arith.constant 0.000000e+00 : f32
    %95 = vector.broadcast %cst_59 : f32 to vector<8x32xf32>
    %96 = arith.maximumf %94, %95 : vector<8x32xf32>
    %c0_60 = arith.constant 0 : index
    %c640 = arith.constant 640 : index
    %c0_61 = arith.constant 0 : index
    %97 = vector.load %arg1[%c0_60, %c640, %c0_61] : memref<1x864x128xf32, #tpu.memory_space<vmem>>, vector<1x32x64xf32>
    %98 = vector.shape_cast %97 : vector<1x32x64xf32> to vector<32x64xf32>
    %cst_62 = arith.constant dense<0.000000e+00> : vector<8x64xf32>
    %99 = tpu.matmul %96, %98, %cst_62 {dimension_numbers = #tpu.dot_dimension_numbers<[1], [0], [0], [1], [0, 0, 1, 1], [], []>} : vector<8x32xf32>, vector<32x64xf32>, vector<8x64xf32> -> vector<8x64xf32>
    %100 = arith.addf %87, %99 : vector<8x64xf32>
    %c0_63 = arith.constant 0 : index
    %c672 = arith.constant 672 : index
    %c0_64 = arith.constant 0 : index
    %101 = vector.load %arg1[%c0_63, %c672, %c0_64] : memref<1x864x128xf32, #tpu.memory_space<vmem>>, vector<1x1x64xf32>
    %102 = vector.shape_cast %101 : vector<1x1x64xf32> to vector<1x64xf32>
    %103 = vector.broadcast %102 : vector<1x64xf32> to vector<8x64xf32>
    %104 = arith.addf %100, %103 : vector<8x64xf32>
    %c0_65 = arith.constant 0 : index
    %c680 = arith.constant 680 : index
    %c0_66 = arith.constant 0 : index
    %105 = vector.load %arg1[%c0_65, %c680, %c0_66] : memref<1x864x128xf32, #tpu.memory_space<vmem>>, vector<1x64x32xf32>
    %106 = vector.shape_cast %105 : vector<1x64x32xf32> to vector<64x32xf32>
    %cst_67 = arith.constant dense<0.000000e+00> : vector<8x32xf32>
    %107 = tpu.matmul %104, %106, %cst_67 {dimension_numbers = #tpu.dot_dimension_numbers<[1], [0], [0], [1], [0, 0, 1, 1], [], []>} : vector<8x64xf32>, vector<64x32xf32>, vector<8x32xf32> -> vector<8x32xf32>
    %c0_68 = arith.constant 0 : index
    %c744 = arith.constant 744 : index
    %c0_69 = arith.constant 0 : index
    %108 = vector.load %arg1[%c0_68, %c744, %c0_69] : memref<1x864x128xf32, #tpu.memory_space<vmem>>, vector<1x1x32xf32>
    %109 = vector.shape_cast %108 : vector<1x1x32xf32> to vector<1x32xf32>
    %110 = vector.broadcast %109 : vector<1x32xf32> to vector<8x32xf32>
    %111 = arith.addf %107, %110 : vector<8x32xf32>
    %cst_70 = arith.constant 0.000000e+00 : f32
    %112 = vector.broadcast %cst_70 : f32 to vector<8x32xf32>
    %113 = arith.maximumf %111, %112 : vector<8x32xf32>
    %c0_71 = arith.constant 0 : index
    %c752 = arith.constant 752 : index
    %c0_72 = arith.constant 0 : index
    %114 = vector.load %arg1[%c0_71, %c752, %c0_72] : memref<1x864x128xf32, #tpu.memory_space<vmem>>, vector<1x32x64xf32>
    %115 = vector.shape_cast %114 : vector<1x32x64xf32> to vector<32x64xf32>
    %cst_73 = arith.constant dense<0.000000e+00> : vector<8x64xf32>
    %116 = tpu.matmul %113, %115, %cst_73 {dimension_numbers = #tpu.dot_dimension_numbers<[1], [0], [0], [1], [0, 0, 1, 1], [], []>} : vector<8x32xf32>, vector<32x64xf32>, vector<8x64xf32> -> vector<8x64xf32>
    %117 = arith.addf %104, %116 : vector<8x64xf32>
    %c0_74 = arith.constant 0 : index
    %c784 = arith.constant 784 : index
    %c0_75 = arith.constant 0 : index
    %118 = vector.load %arg1[%c0_74, %c784, %c0_75] : memref<1x864x128xf32, #tpu.memory_space<vmem>>, vector<1x1x64xf32>
    %119 = vector.shape_cast %118 : vector<1x1x64xf32> to vector<1x64xf32>
    %120 = vector.broadcast %119 : vector<1x64xf32> to vector<8x64xf32>
    %121 = arith.addf %117, %120 : vector<8x64xf32>
    %c0_76 = arith.constant 0 : index
    %c792 = arith.constant 792 : index
    %c0_77 = arith.constant 0 : index
    %122 = vector.load %arg1[%c0_76, %c792, %c0_77] : memref<1x864x128xf32, #tpu.memory_space<vmem>>, vector<1x64x128xf32>
    %123 = vector.shape_cast %122 : vector<1x64x128xf32> to vector<64x128xf32>
    %cst_78 = arith.constant dense<0.000000e+00> : vector<8x128xf32>
    %124 = tpu.matmul %121, %123, %cst_78 {dimension_numbers = #tpu.dot_dimension_numbers<[1], [0], [0], [1], [0, 0, 1, 1], [], []>} : vector<8x64xf32>, vector<64x128xf32>, vector<8x128xf32> -> vector<8x128xf32>
    %c0_79 = arith.constant 0 : index
    %c856 = arith.constant 856 : index
    %c0_80 = arith.constant 0 : index
    %125 = vector.load %arg1[%c0_79, %c856, %c0_80] : memref<1x864x128xf32, #tpu.memory_space<vmem>>, vector<1x1x128xf32>
    %126 = vector.shape_cast %125 : vector<1x1x128xf32> to vector<1x128xf32>
    %127 = vector.broadcast %126 : vector<1x128xf32> to vector<8x128xf32>
    %128 = arith.addf %124, %127 : vector<8x128xf32>
    %c0_81 = arith.constant 0 : index
    %c0_82 = arith.constant 0 : index
    %c0_83 = arith.constant 0 : index
    %129 = vector.load %arg2[%c0_81, %c0_82, %c0_83] : memref<1x8x128xf32, #tpu.memory_space<vmem>>, vector<1x8x128xf32>
    %130 = vector.shape_cast %129 : vector<1x8x128xf32> to vector<8x128xf32>
    %131 = vector.shape_cast %128 : vector<8x128xf32> to vector<1x8x128xf32>
    tpu.vector_store %arg2[%c0_81, %c0_82, %c0_83], %131 {strides = array<i32>} : memref<1x8x128xf32, #tpu.memory_space<vmem>>, vector<1x8x128xf32>,
    return
  }
  func.func @transform_0(%arg0: i32) -> (i32, i32, i32) {
    %c0_i32 = arith.constant 0 : i32
    %c0_i32_0 = arith.constant 0 : i32
    %c0_i32_1 = arith.constant 0 : i32
    return %arg0, %c0_i32, %c0_i32_0 : i32, i32, i32
  }
  func.func @transform_1(%arg0: i32) -> (i32, i32, i32) {
    %c0_i32 = arith.constant 0 : i32
    %c0_i32_0 = arith.constant 0 : i32
    %c0_i32_1 = arith.constant 0 : i32
    return %arg0, %c0_i32, %c0_i32_0 : i32, i32, i32
  }
}

</mosaic_0001>

<bundles_post_ra>
// kernel: squeeze.38
= control target key start
LH: loop header
LB: loop body
LE: loop exit
PB: predicated region body
PF: predicated region fallthrough
CT: control target
= control target key end

     0   :  { %s117_s10 = smov 91   ;;  %s118_s11 = smov 77   ;;  %vm3_vm0 = vcmask 56320   ;;  %vm9_vm1 = vcmask 802520   ;;  %vm15_vm2 = vcmask 745120   ;;  %vm21_vm3 = vcmask 687720   ;;  %s185_s0 = inlined_call_operand.vmem [shape: s32[2,1,7,7], index: 0, kind: input, shape index: {}]   ;;  %s186_s1 = inlined_call_operand.vmem [shape: s32[98,1], index: 1, kind: output, shape index: {}]  }
   0x1   :  { %v91_v0 = vld [vmem:[%s185_s0 + $0xe] sm:$0x1]   ;;  %v93_v1 = vld [vmem:[%s185_s0 + $0xc] sm:$0x1]   ;;  %v92_v2 = vld [vmem:[%s185_s0 + $0xd] sm:$0x1]  }
   0x2   :  { %7 = vrot.lane.b32.xlu0 %v91_v0, %s117_s10  ;;  %19 = vrot.lane.b32.xlu1 %v93_v1, %s118_s11  ;;  %v94_v3 = vld [vmem:[%s185_s0 + $0xb] sm:$0x1]   ;;  %s119_s16 = smov 84   ;;  %s120_s17 = smov 70   ;;  %v95_v4 = vld [vmem:[%s185_s0 + $0xa] sm:$0x1]  }
   0x3   :  { %v96_v5 = vld [vmem:[%s185_s0 + $0x9] sm:$0x1]   ;;  %v2_v6 = vld [vmem:[%s185_s0] sm:$0x1]   ;;  %s121_s24 = smov 63   ;;  %s122_s25 = smov 56  }
   0x4   :  { %4 = vst.msk [vmem:[#allocation0] sm:$0x1] %vm3_vm0, %v2_v6   ;;  %v97_v7 = vld [vmem:[%s185_s0 + $0x8] sm:$0x1]   ;;  %v98_v8 = vld [vmem:[%s185_s0 + $0x6] sm:$0x1]  }
   0x5   :  { %s123_s30 = smov 49   ;;  %s124_s2 = smov 42   ;;  %v99_v9 = vld [vmem:[%s185_s0 + $0x5] sm:$0x1]   ;;  %v100_v10 = vld [vmem:[%s185_s0 + $0x4] sm:$0x1]  }
   0x6   :  { %13 = vrot.lane.b32.xlu0 %v92_v2, %s119_s16  ;;  %25 = vrot.lane.b32.xlu1 %v94_v3, %s120_s17  ;;  %s125_s7 = smov 35   ;;  %s126_s8 = smov 28   ;;  %v101_v11 = vld [vmem:[%s185_s0 + $0x3] sm:$0x1]   ;;  %v102_v12 = vld [vmem:[%s185_s0 + $0x2] sm:$0x1]  }
   0x7   :  { %s127_s13 = smov 21   ;;  %s128_s14 = smov 14   ;;  %v103_v13 = vld [vmem:[%s185_s0 + $0x1] sm:$0x1]   ;;  %vm27_vm4 = vcmask 630320   ;;  %vm33_vm5 = vcmask 572920  }
   0x8   :  { %s129_s0 = smov 7   ;;  %vm39_vm6 = vcmask 515520   ;;  %vm45_vm7 = vcmask 458120   ;;  %vm51_vm8 = vcmask 400720   ;;  %vm57_vm9 = vcmask 343320  }
   0x9   :  { %vm63_vm10 = vcmask 285920   ;;  %vm69_vm11 = vcmask 228520   ;;  %vm75_vm12 = vcmask 171120   ;;  %vm81_vm13 = vcmask 113720  }
   0xa   :  { %31 = vrot.lane.b32.xlu0 %v95_v4, %s121_s24  ;;  %37 = vrot.lane.b32.xlu1 %v96_v5, %s122_s25 }
   0xe   :  { %43 = vrot.lane.b32.xlu0 %v97_v7, %s123_s30  ;;  %49 = vrot.lane.b32.xlu1 %v98_v8, %s124_s2 }
  0x12   :  { %55 = vrot.lane.b32.xlu0 %v99_v9, %s125_s7  ;;  %61 = vrot.lane.b32.xlu1 %v100_v10, %s126_s8 }
  0x16   :  { %67 = vrot.lane.b32.xlu0 %v101_v11, %s127_s13  ;;  %73 = vrot.lane.b32.xlu1 %v102_v12, %s128_s14 }
  0x1a   :  { %79 = vrot.lane.b32.xlu0 %v103_v13, %s129_s0 }
  0x74   :  { %v8_v14 = vpop.permute.xlu0 %7   ;;  %v20_v15 = vpop.permute.xlu1 %19  }
  0x75   :  { %10 = vst.msk [vmem:[#allocation0] sm:$0x1] %vm9_vm1, %v8_v14  }
  0x78   :  { %v14_v16 = vpop.permute.xlu0 %13   ;;  %v26_v17 = vpop.permute.xlu1 %25  }
  0x79   :  { %16 = vst.msk [vmem:[#allocation0] sm:$0x1] %vm15_vm2, %v14_v16  }
  0x7a   :  { %22 = vst.msk [vmem:[#allocation0] sm:$0x1] %vm21_vm3, %v20_v15  }
  0x7b   :  { %28 = vst.msk [vmem:[#allocation0] sm:$0x1] %vm27_vm4, %v26_v17  }
  0x7c   :  { %v32_v18 = vpop.permute.xlu0 %31   ;;  %v38_v19 = vpop.permute.xlu1 %37  }
  0x7d   :  { %34 = vst.msk [vmem:[#allocation0] sm:$0x1] %vm33_vm5, %v32_v18  }
  0x7e   :  { %40 = vst.msk [vmem:[#allocation0] sm:$0x1] %vm39_vm6, %v38_v19  }
  0x80   :  { %v44_v20 = vpop.permute.xlu0 %43   ;;  %v50_v21 = vpop.permute.xlu1 %49  }
  0x81   :  { %46 = vst.msk [vmem:[#allocation0] sm:$0x1] %vm45_vm7, %v44_v20  }
  0x82   :  { %52 = vst.msk [vmem:[#allocation0] sm:$0x1] %vm51_vm8, %v50_v21  }
  0x84   :  { %v56_v22 = vpop.permute.xlu0 %55   ;;  %v62_v23 = vpop.permute.xlu1 %61  }
  0x85   :  { %58 = vst.msk [vmem:[#allocation0] sm:$0x1] %vm57_vm9, %v56_v22  }
  0x86   :  { %64 = vst.msk [vmem:[#allocation0] sm:$0x1] %vm63_vm10, %v62_v23  }
  0x88   :  { %v68_v24 = vpop.permute.xlu0 %67   ;;  %v74_v25 = vpop.permute.xlu1 %73  }
  0x89   :  { %70 = vst.msk [vmem:[#allocation0] sm:$0x1] %vm69_vm11, %v68_v24  }
  0x8a   :  { %76 = vst.msk [vmem:[#allocation0] sm:$0x1] %vm75_vm12, %v74_v25  }
  0x8c   :  { %v80_v26 = vpop.permute.xlu0 %79  }
  0x8d   :  { %82 = vst.msk [vmem:[#allocation0] sm:$0x1] %vm81_vm13, %v80_v26  }
  0x94   :  { %v87_v27 = vld [vmem:[#allocation0] sm:$0x1] }
  0x95   :  { %90 = vst [vmem:[%s186_s1] sm:$0x1] %v87_v27 }

// kernel: control_critic_forward.1
= control target key start
LH: loop header
LB: loop body
LE: loop exit
PB: predicated region body
PF: predicated region fallthrough
CT: control target
= control target key end

     0   :  { %s2971_s6 = smov 0   ;;  %s3550_s0 = inlined_call_operand.vmem [shape: f32[2,864,128], index: 0, kind: input, shape index: {}]   ;;  %s3551_s1 = inlined_call_operand.vmem [shape: f32[2,8,128], index: 1, kind: output, shape index: {}]  }
   0x1 LB: > { %s2353_s7 = sadd.s32 4294967295, %s2952_s6   ;;  %p2357_p0 = scmp.ge.s32.totalorder %s2952_s6, 1  ;;  %s2952_s6 = sphi %s2971_s6, %s11_s6  }
   0x2   : > { %p87_p1 = scmp.lt.s32.totalorder %s2952_s6, 3 }
   0x4   : > { %p88_p2 = pnand %p2357_p0, %p87_p1 }
   0x5   : > { %p106_p3 = scmp.lt.s32.totalorder (!%p88_p2), %s2353_s7, 1  ;;  %s2956_s12 = smov (!%p88_p2), 112  }
   0x6   : > { %91 = sbr.rel (%p88_p2) target bundleno = 2616 (0xa38), region = 24  ;;  %s2957_s13 = smov (!%p88_p2), 120  }
   0x7   : > { %s2958_s14 = smov (!%p88_p2), 104  }
   0xb   : > { %v2954_v0 = vmov 0.0   ;;  %vm3553_vm0 = vmmov 0   ;;  %s3563_s7 = smov (!%p106_p3, %s2353_s7), 1  ;;  %vm3555_vm1 = vcmask 1043456   ;;  %vm135_vm2 = vcmask 97280  }
   0xc   : > { %2617 = vmatprep.subr.mxu0 %v2954_v0  ;;  %2621 = vmatprep.mubr.msk.f32.mxu0 %vm3553_vm0, %v2954_v0  ;;  %s2924_s8 = smul.u32 864, %s3563_s7  ;;  %vm323_vm3 = vcmask 31744   ;;  %vm3552_vm4 = vcmask 261120   ;;  %vm769_vm5 = vcmask 64512   ;;  %vm944_vm6 = vcmask 523264   ;;  %s2359_s15 = sshll.u32 %s3563_s7, 3 }
   0xd   : > { %2920 = vmatprep.subr.mxu1 %v2954_v0  ;;  %2657 = vmatprep.mubr.msk.f32.mxu1 %vm3553_vm0, %v2954_v0  ;;  %s114_s18 = scalar_lea.vmem %s3551_s1, %s2359_s15 }
   0xe   : > { %s2991_s11 = scalar_lea.vmem %s3550_s0, %s2924_s8 }
   0xf   : > { %v129_v1 = vld [vmem:[%s2991_s11 + $0xd0] sm:$0xf]  ;;  %v128_v2 = vld [vmem:[%s2991_s11 + $0xc8] sm:$0xff]  ;;  %v115_v3 = vld [vmem:[%s2991_s11] sm:$0xff] }
  0x10   : > { %2618 = vmatpush3.msk.msra.mxu0 %vm3555_vm1, %v129_v1  ;;  %2922 = vmatpush3.msk.msra.mxu1 %vm3555_vm1, %v129_v1  ;;  %v127_v4 = vld [vmem:[%s2991_s11 + $0x60] sm:$0xff]  ;;  %v116_v5 = vld [vmem:[%s2991_s11 + $0x8] sm:$0xff]  ;;  %v117_v6 = vld [vmem:[%s2991_s11 + $0x10] sm:$0xff] }
  0x11   : > { %2619 = vmatprep.subr.mxu0 %v2954_v0  ;;  %2921 = vmatprep.subr.mxu1 %v2954_v0  ;;  %v118_v7 = vld [vmem:[%s2991_s11 + $0x18] sm:$0xff]  ;;  %v119_v8 = vld [vmem:[%s2991_s11 + $0x20] sm:$0xff]  ;;  %v120_v9 = vld [vmem:[%s2991_s11 + $0x28] sm:$0xff] }
  0x12   : > { %2620 = vmatpush3.msra.mxu0 %v128_v2  ;;  %2923 = vmatpush3.msra.mxu1 %v128_v2  ;;  %v121_v10 = vld [vmem:[%s2991_s11 + $0x30] sm:$0xff]  ;;  %v122_v11 = vld [vmem:[%s2991_s11 + $0x38] sm:$0xff]  ;;  %v123_v12 = vld [vmem:[%s2991_s11 + $0x40] sm:$0xff] }
  0x13   : > { %2622 = vmatmul.mubr.msk.f32.vlgmr.msra.gmra.mxu0 %vm135_vm2, %v115_v3  ;;  %2660 = vmatprep.subr.mxu1 %v2954_v0  ;;  %v124_v13 = vld [vmem:[%s2991_s11 + $0x48] sm:$0xff]  ;;  %v125_v14 = vld [vmem:[%s2991_s11 + $0x50] sm:$0xff]  ;;  %v126_v15 = vld [vmem:[%s2991_s11 + $0x58] sm:$0xff] }
  0x14   : > { %2624 = vmatprep.mubr.msk.f32.mxu0 %vm3553_vm0, %v2954_v0  ;;  %2658 = vmatmul.mubr.msk.f32.vlgmr.msra.gmra.mxu1 %vm135_vm2, %v127_v4  ;;  %v322_v16 = vld [vmem:[%s2991_s11 + $0xe0] sm:$0xf]  ;;  %v3053_v17 = vld [vmem:[%s2991_s11 + $0xd8] ss:$0 sm:$0xff] }
  0x15   : > { %2662 = vmatprep.mubr.msk.f32.mxu1 %vm3553_vm0, %v2954_v0  ;;  %2661 = vmatpush3.msk.msra.mxu1 %vm3555_vm1, %v322_v16 }
  0x17   : > { %2625 = vmatmul.mubr.msk.f32.gmra.mxu0 %vm135_vm2, %v116_v5 }
  0x18   : > { %2627 = vmatprep.mubr.msk.f32.mxu0 %vm3553_vm0, %v2954_v0 }
  0x1b   : > { %2628 = vmatmul.mubr.msk.f32.gmra.mxu0 %vm135_vm2, %v117_v6 }
  0x1c   : > { %2630 = vmatprep.mubr.msk.f32.mxu0 %vm3553_vm0, %v2954_v0 }
  0x1f   : > { %2631 = vmatmul.mubr.msk.f32.gmra.mxu0 %vm135_vm2, %v118_v7 }
  0x20   : > { %2633 = vmatprep.mubr.msk.f32.mxu0 %vm3553_vm0, %v2954_v0 }
  0x23   : > { %2634 = vmatmul.mubr.msk.f32.gmra.mxu0 %vm135_vm2, %v119_v8  ;;  %v756_v8 = vld [vmem:[%s2991_s11 + $0xf0] sm:$0xff] }
  0x24   : > { %2636 = vmatprep.mubr.msk.f32.mxu0 %vm3553_vm0, %v2954_v0  ;;  %2701 = vmatprep.subr.mxu1 %v756_v8 }
  0x27   : > { %2637 = vmatmul.mubr.msk.f32.gmra.mxu0 %vm135_vm2, %v120_v9 }
  0x28   : > { %2639 = vmatprep.mubr.msk.f32.mxu0 %vm3553_vm0, %v2954_v0 }
  0x2b   : > { %2640 = vmatmul.mubr.msk.f32.gmra.mxu0 %vm135_vm2, %v121_v10 }
  0x2c   : > { %2642 = vmatprep.mubr.msk.f32.mxu0 %vm3553_vm0, %v2954_v0 }
  0x2f   : > { %2643 = vmatmul.mubr.msk.f32.gmra.mxu0 %vm135_vm2, %v122_v11 }
  0x30   : > { %2645 = vmatprep.mubr.msk.f32.mxu0 %vm3553_vm0, %v2954_v0 }
  0x33   : > { %2646 = vmatmul.mubr.msk.f32.gmra.mxu0 %vm135_vm2, %v123_v12 }
  0x34   : > { %2648 = vmatprep.mubr.msk.f32.mxu0 %vm3553_vm0, %v2954_v0 }
  0x37   : > { %2649 = vmatmul.mubr.msk.f32.gmra.mxu0 %vm135_vm2, %v124_v13 }
  0x38   : > { %2651 = vmatprep.mubr.msk.f32.mxu0 %vm3553_vm0, %v2954_v0 }
  0x3b   : > { %2652 = vmatmul.mubr.msk.f32.gmra.mxu0 %vm135_vm2, %v125_v14 }
  0x3c   : > { %2654 = vmatprep.mubr.msk.f32.mxu0 %vm3553_vm0, %v2954_v0 }
  0x3f   : > { %2655 = vmatmul.mubr.msk.f32.gmra.mxu0 %vm135_vm2, %v126_v15 }
  0xd3   : > { %v245_v18 = vpop.f32.mrf.mxu0 }
  0xd4   : > { %v246_v19 = vadd.f32 %v3053_v17, %v245_v18  ;;  %v3056_v20 = vpop.f32.mrf.mxu1 }
  0xd5   : > { %v2623_v21 = vpop.f32.mrf.mxu0  ;;  %v306_v3 = vadd.f32 %v3053_v17, %v3056_v20 }
  0xd6   : > { %v309_v22 = vmax.f32 %v246_v19, 0.0  ;;  %v2659_v23 = vpop.f32.mrf.mxu1 }
  0xd7   : > { %v250_v24 = vpop.f32.mrf.mxu0  ;;  %v321_v6 = vmax.f32 %v306_v3, 0.0  ;;  %v938_v3 = vld [vmem:[%s2991_s11 + $0x190] sm:$0xff] }
  0xd8   : > { %v251_v25 = vadd.f32 %v3053_v17, %v250_v24  ;;  %2663 = vmatmul.mubr.msk.f32.vlgmr.msra.gmra.mxu1 %vm323_vm3, %v309_v22  ;;  %2721 = vmatprep.subr.mxu0 %v938_v3 }
  0xd9   : > { %v2626_v26 = vpop.f32.mrf.mxu0  ;;  %2665 = vmatprep.mubr.msk.f32.mxu1 %vm3553_vm0, %v2954_v0  ;;  %2702 = vmatpush3.msra.mxu1 %v756_v8 }
  0xda   : > { %v310_v27 = vmax.f32 %v251_v25, 0.0  ;;  %2722 = vmatpush3.msra.mxu0 %v938_v3 }
  0xdb   : > { %v255_v28 = vpop.f32.mrf.mxu0 }
  0xdc   : > { %v256_v29 = vadd.f32 %v3053_v17, %v255_v28  ;;  %2666 = vmatmul.mubr.msk.f32.gmra.mxu1 %vm323_vm3, %v310_v27 }
  0xdd   : > { %v2629_v30 = vpop.f32.mrf.mxu0  ;;  %2668 = vmatprep.mubr.msk.f32.mxu1 %vm3553_vm0, %v2954_v0 }
  0xde   : > { %v311_v31 = vmax.f32 %v256_v29, 0.0 }
  0xdf   : > { %v260_v32 = vpop.f32.mrf.mxu0 }
  0xe0   : > { %v261_v33 = vadd.f32 %v3053_v17, %v260_v32  ;;  %2669 = vmatmul.mubr.msk.f32.gmra.mxu1 %vm323_vm3, %v311_v31 }
  0xe1   : > { %v2632_v34 = vpop.f32.mrf.mxu0  ;;  %2671 = vmatprep.mubr.msk.f32.mxu1 %vm3553_vm0, %v2954_v0 }
  0xe2   : > { %v312_v35 = vmax.f32 %v261_v33, 0.0 }
  0xe3   : > { %v265_v36 = vpop.f32.mrf.mxu0 }
  0xe4   : > { %v266_v37 = vadd.f32 %v3053_v17, %v265_v36  ;;  %2672 = vmatmul.mubr.msk.f32.gmra.mxu1 %vm323_vm3, %v312_v35 }
  0xe5   : > { %v2635_v38 = vpop.f32.mrf.mxu0  ;;  %2674 = vmatprep.mubr.msk.f32.mxu1 %vm3553_vm0, %v2954_v0 }
  0xe6   : > { %v313_v39 = vmax.f32 %v266_v37, 0.0 }
  0xe7   : > { %v270_v40 = vpop.f32.mrf.mxu0 }
  0xe8   : > { %v271_v41 = vadd.f32 %v3053_v17, %v270_v40  ;;  %2675 = vmatmul.mubr.msk.f32.gmra.mxu1 %vm323_vm3, %v313_v39 }
  0xe9   : > { %v2638_v42 = vpop.f32.mrf.mxu0  ;;  %2677 = vmatprep.mubr.msk.f32.mxu1 %vm3553_vm0, %v2954_v0 }
  0xea   : > { %v314_v43 = vmax.f32 %v271_v41, 0.0 }
  0xeb   : > { %v275_v44 = vpop.f32.mrf.mxu0 }
  0xec   : > { %v276_v45 = vadd.f32 %v3053_v17, %v275_v44  ;;  %2678 = vmatmul.mubr.msk.f32.gmra.mxu1 %vm323_vm3, %v314_v43 }
  0xed   : > { %2680 = vmatprep.mubr.msk.f32.mxu1 %vm3553_vm0, %v2954_v0  ;;  %v2641_v46 = vpop.f32.mrf.mxu0 }
  0xee   : > { %v315_v47 = vmax.f32 %v276_v45, 0.0 }
  0xef   : > { %v280_v48 = vpop.f32.mrf.mxu0 }
  0xf0   : > { %2681 = vmatmul.mubr.msk.f32.gmra.mxu1 %vm323_vm3, %v315_v47  ;;  %v281_v49 = vadd.f32 %v3053_v17, %v280_v48 }
  0xf1   : > { %v2644_v50 = vpop.f32.mrf.mxu0  ;;  %2683 = vmatprep.mubr.msk.f32.mxu1 %vm3553_vm0, %v2954_v0 }
  0xf2   : > { %v316_v51 = vmax.f32 %v281_v49, 0.0 }
  0xf3   : > { %v285_v52 = vpop.f32.mrf.mxu0 }
  0xf4   : > { %v286_v53 = vadd.f32 %v3053_v17, %v285_v52  ;;  %2684 = vmatmul.mubr.msk.f32.gmra.mxu1 %vm323_vm3, %v316_v51 }
  0xf5   : > { %2686 = vmatprep.mubr.msk.f32.mxu1 %vm3553_vm0, %v2954_v0  ;;  %v2647_v54 = vpop.f32.mrf.mxu0 }
  0xf6   : > { %v317_v55 = vmax.f32 %v286_v53, 0.0 }
  0xf7   : > { %v290_v56 = vpop.f32.mrf.mxu0 }
  0xf8   : > { %2687 = vmatmul.mubr.msk.f32.gmra.mxu1 %vm323_vm3, %v317_v55  ;;  %v291_v57 = vadd.f32 %v3053_v17, %v290_v56 }
  0xf9   : > { %v2650_v58 = vpop.f32.mrf.mxu0  ;;  %2689 = vmatprep.mubr.msk.f32.mxu1 %vm3553_vm0, %v2954_v0 }
  0xfa   : > { %v318_v59 = vmax.f32 %v291_v57, 0.0 }
  0xfb   : > { %v295_v60 = vpop.f32.mrf.mxu0 }
  0xfc   : > { %v296_v61 = vadd.f32 %v3053_v17, %v295_v60  ;;  %2690 = vmatmul.mubr.msk.f32.gmra.mxu1 %vm323_vm3, %v318_v59 }
  0xfd   : > { %2692 = vmatprep.mubr.msk.f32.mxu1 %vm3553_vm0, %v2954_v0  ;;  %v2653_v62 = vpop.f32.mrf.mxu0 }
  0xfe   : > { %v319_v63 = vmax.f32 %v296_v61, 0.0 }
  0xff   : > { %v300_v1 = vpop.f32.mrf.mxu0 }
 0x100   : > { %2693 = vmatmul.mubr.msk.f32.gmra.mxu1 %vm323_vm3, %v319_v63  ;;  %v301_v2 = vadd.f32 %v3053_v17, %v300_v1 }
 0x101   : > { %v2656_v4 = vpop.f32.mrf.mxu0  ;;  %2695 = vmatprep.mubr.msk.f32.mxu1 %vm3553_vm0, %v2954_v0 }
 0x102   : > { %v320_v5 = vmax.f32 %v301_v2, 0.0 }
 0x104   : > { %2696 = vmatmul.mubr.msk.f32.gmra.mxu1 %vm323_vm3, %v320_v5 }
 0x105   : > { %2698 = vmatprep.mubr.msk.f32.mxu1 %vm3553_vm0, %v2954_v0 }
 0x108   : > { %2699 = vmatmul.mubr.msk.f32.gmra.mxu1 %vm323_vm3, %v321_v6  ;;  %v937_v6 = vld [vmem:[%s2991_s11 + $0x188] sm:$0xff] }
 0x109   : > { %2723 = vmatprep.subr.mxu0 %v937_v6 }
 0x10a   : > { %2724 = vmatpush3.msra.mxu0 %v937_v6 }
 0x198   : > { %v432_v7 = vpop.f32.mrf.mxu1 }
 0x199   : > { %497 = vst.msk [vmem:[#allocation2] sm:$0xff] %vm3552_vm4, %v432_v7  ;;  %v936_v7 = vld [vmem:[%s2991_s11 + $0x180] sm:$0xff] }
 0x19a   : > { %v2664_v9 = vpop.f32.mrf.mxu1  ;;  %2725 = vmatprep.subr.mxu0 %v936_v7 }
 0x19b   : > { %2726 = vmatpush3.msra.mxu0 %v936_v7 }
 0x19c   : > { %v437_v10 = vpop.f32.mrf.mxu1 }
 0x19d   : > { %498 = vst.msk [vmem:[#allocation2 + $0x8] sm:$0xff] %vm3552_vm4, %v437_v10  ;;  %v935_v10 = vld [vmem:[%s2991_s11 + $0x178] sm:$0xff] }
 0x19e   : > { %v2667_v11 = vpop.f32.mrf.mxu1  ;;  %2727 = vmatprep.subr.mxu0 %v935_v10 }
 0x19f   : > { %v934_v11 = vld [vmem:[%s2991_s11 + $0x170] sm:$0xff]  ;;  %2728 = vmatpush3.msra.mxu0 %v935_v10 }
 0x1a0   : > { %v442_v12 = vpop.f32.mrf.mxu1  ;;  %2729 = vmatprep.subr.mxu0 %v934_v11 }
 0x1a1   : > { %499 = vst.msk [vmem:[#allocation2 + $0x10] sm:$0xff] %vm3552_vm4, %v442_v12  ;;  %2730 = vmatpush3.msra.mxu0 %v934_v11 }
 0x1a2   : > { %v2670_v13 = vpop.f32.mrf.mxu1 }
 0x1a3   : > { %v510_v13 = vld [vmem:[#allocation2] sm:$0xff] }
 0x1a4   : > { %v447_v14 = vpop.f32.mrf.mxu1  ;;  %v594_v15 = vld [vmem:[#allocation2 + $0x7] sm:$0xff] }
 0x1a5   : > { %v522_v16 = vld [vmem:[#allocation2 + $0x1] sm:$0xff]  ;;  %500 = vst.msk [vmem:[#allocation2 + $0x18] sm:$0xff] %vm3552_vm4, %v447_v14  ;;  %618 = vrot.lane.b32.xlu1 %v594_v15, %s2956_s12 }
 0x1a6   : > { %546 = vrot.lane.b32.xlu0 %v522_v16, %s2957_s13  ;;  %v2673_v17 = vpop.f32.mrf.mxu1  ;;  %v3115_v19 = vld [vmem:[#allocation2 + $0x8] sm:$0xff] }
 0x1a7   : > { %v3197_v17 = vld [vmem:[%s2991_s11 + $0xe8] ss:$0 sm:$0xff] }
 0x1a8   : > { %v452_v18 = vpop.f32.mrf.mxu1  ;;  %v523_v20 = vld [vmem:[#allocation2 + $0x9] sm:$0xff] }
 0x1a9   : > { %501 = vst.msk [vmem:[#allocation2 + $0x20] sm:$0xff] %vm3552_vm4, %v452_v18  ;;  %679 = vrot.lane.b32.xlu1 %v3115_v19, %s2958_s14  ;;  %v595_v23 = vld [vmem:[#allocation2 + $0xf] sm:$0xff] }
 0x1aa   : > { %548 = vrot.lane.b32.xlu0 %v523_v20, %s2957_s13  ;;  %v2676_v21 = vpop.f32.mrf.mxu1  ;;  %v3124_v27 = vld [vmem:[#allocation2 + $0x10] sm:$0xff] }
 0x1ac   : > { %v457_v22 = vpop.f32.mrf.mxu1  ;;  %v524_v24 = vld [vmem:[#allocation2 + $0x11] sm:$0xff] }
 0x1ad   : > { %502 = vst.msk [vmem:[#allocation2 + $0x28] sm:$0xff] %vm3552_vm4, %v457_v22  ;;  %620 = vrot.lane.b32.xlu1 %v595_v23, %s2956_s12  ;;  %v596_v28 = vld [vmem:[#allocation2 + $0x17] sm:$0xff] }
 0x1ae   : > { %550 = vrot.lane.b32.xlu0 %v524_v24, %s2957_s13  ;;  %v2679_v25 = vpop.f32.mrf.mxu1  ;;  %v3130_v30 = vld [vmem:[#allocation2 + $0x18] sm:$0xff] }
 0x1b0   : > { %v462_v26 = vpop.f32.mrf.mxu1  ;;  %v525_v31 = vld [vmem:[#allocation2 + $0x19] sm:$0xff] }
 0x1b1   : > { %503 = vst.msk [vmem:[#allocation2 + $0x30] sm:$0xff] %vm3552_vm4, %v462_v26  ;;  %681 = vrot.lane.b32.xlu1 %v3124_v27, %s2958_s14  ;;  %v597_v34 = vld [vmem:[#allocation2 + $0x1f] sm:$0xff] }
 0x1b2   : > { %622 = vrot.lane.b32.xlu0 %v596_v28, %s2956_s12  ;;  %v2682_v29 = vpop.f32.mrf.mxu1  ;;  %v3139_v38 = vld [vmem:[#allocation2 + $0x20] sm:$0xff] }
 0x1b4   : > { %v467_v32 = vpop.f32.mrf.mxu1  ;;  %v526_v35 = vld [vmem:[#allocation2 + $0x21] sm:$0xff] }
 0x1b5   : > { %683 = vrot.lane.b32.xlu1 %v3130_v30, %s2958_s14  ;;  %504 = vst.msk [vmem:[#allocation2 + $0x38] sm:$0xff] %vm3552_vm4, %v467_v32  ;;  %v598_v39 = vld [vmem:[#allocation2 + $0x27] sm:$0xff] }
 0x1b6   : > { %552 = vrot.lane.b32.xlu0 %v525_v31, %s2957_s13  ;;  %v2685_v33 = vpop.f32.mrf.mxu1  ;;  %v3145_v42 = vld [vmem:[#allocation2 + $0x28] sm:$0xff] }
 0x1b8   : > { %v472_v36 = vpop.f32.mrf.mxu1  ;;  %v527_v43 = vld [vmem:[#allocation2 + $0x29] sm:$0xff] }
 0x1b9   : > { %624 = vrot.lane.b32.xlu1 %v597_v34, %s2956_s12  ;;  %505 = vst.msk [vmem:[#allocation2 + $0x40] sm:$0xff] %vm3552_vm4, %v472_v36  ;;  %v599_v46 = vld [vmem:[#allocation2 + $0x2f] sm:$0xff] }
 0x1ba   : > { %554 = vrot.lane.b32.xlu0 %v526_v35, %s2957_s13  ;;  %v2688_v37 = vpop.f32.mrf.mxu1  ;;  %v3154_v50 = vld [vmem:[#allocation2 + $0x30] sm:$0xff] }
 0x1bc   : > { %v477_v40 = vpop.f32.mrf.mxu1  ;;  %v528_v47 = vld [vmem:[#allocation2 + $0x31] sm:$0xff] }
 0x1bd   : > { %685 = vrot.lane.b32.xlu1 %v3139_v38, %s2958_s14  ;;  %506 = vst.msk [vmem:[#allocation2 + $0x48] sm:$0xff] %vm3552_vm4, %v477_v40  ;;  %v600_v51 = vld [vmem:[#allocation2 + $0x37] sm:$0xff] }
 0x1be   : > { %626 = vrot.lane.b32.xlu0 %v598_v39, %s2956_s12  ;;  %v2691_v41 = vpop.f32.mrf.mxu1  ;;  %v3160_v54 = vld [vmem:[#allocation2 + $0x38] sm:$0xff] }
 0x1c0   : > { %v482_v44 = vpop.f32.mrf.mxu1  ;;  %v529_v55 = vld [vmem:[#allocation2 + $0x39] sm:$0xff] }
 0x1c1   : > { %687 = vrot.lane.b32.xlu1 %v3145_v42, %s2958_s14  ;;  %507 = vst.msk [vmem:[#allocation2 + $0x50] sm:$0xff] %vm3552_vm4, %v482_v44  ;;  %v601_v56 = vld [vmem:[#allocation2 + $0x3f] sm:$0xff] }
 0x1c2   : > { %556 = vrot.lane.b32.xlu0 %v527_v43, %s2957_s13  ;;  %v2694_v45 = vpop.f32.mrf.mxu1  ;;  %v3167_v58 = vld [vmem:[#allocation2 + $0x40] sm:$0xff] }
 0x1c4   : > { %v487_v48 = vpop.f32.mrf.mxu1  ;;  %v530_v57 = vld [vmem:[#allocation2 + $0x41] sm:$0xff] }
 0x1c5   : > { %628 = vrot.lane.b32.xlu1 %v599_v46, %s2956_s12  ;;  %508 = vst.msk [vmem:[#allocation2 + $0x58] sm:$0xff] %vm3552_vm4, %v487_v48  ;;  %v602_v59 = vld [vmem:[#allocation2 + $0x47] sm:$0xff] }
 0x1c6   : > { %558 = vrot.lane.b32.xlu0 %v528_v47, %s2957_s13  ;;  %v2697_v49 = vpop.f32.mrf.mxu1  ;;  %v3172_v60 = vld [vmem:[#allocation2 + $0x48] sm:$0xff] }
 0x1c8   : > { %v492_v52 = vpop.f32.mrf.mxu1  ;;  %v531_v61 = vld [vmem:[#allocation2 + $0x49] sm:$0xff] }
 0x1c9   : > { %689 = vrot.lane.b32.xlu1 %v3154_v50, %s2958_s14  ;;  %509 = vst.msk [vmem:[#allocation2 + $0x60] sm:$0xff] %vm3552_vm4, %v492_v52  ;;  %v603_v62 = vld [vmem:[#allocation2 + $0x4f] sm:$0xff] }
 0x1ca   : > { %630 = vrot.lane.b32.xlu0 %v600_v51, %s2956_s12  ;;  %v2700_v53 = vpop.f32.mrf.mxu1  ;;  %v3179_v1 = vld [vmem:[#allocation2 + $0x50] sm:$0xff] }
 0x1cc   : > { %v532_v63 = vld [vmem:[#allocation2 + $0x51] sm:$0xff] }
 0x1cd   : > { %691 = vrot.lane.b32.xlu1 %v3160_v54, %s2958_s14  ;;  %v604_v2 = vld [vmem:[#allocation2 + $0x57] sm:$0xff] }
 0x1ce   : > { %560 = vrot.lane.b32.xlu0 %v529_v55, %s2957_s13  ;;  %v3189_v9 = vld [vmem:[#allocation2 + $0x58] sm:$0xff] }
 0x1d0   : > { %v605_v4 = vld [vmem:[#allocation2 + $0x5f] sm:$0xff] }
 0x1d1   : > { %632 = vrot.lane.b32.xlu1 %v601_v56, %s2956_s12  ;;  %v533_v5 = vld [vmem:[#allocation2 + $0x59] sm:$0xff] }
 0x1d2   : > { %562 = vrot.lane.b32.xlu0 %v530_v57, %s2957_s13  ;;  %v666_v8 = vld [vmem:[#allocation2 + $0x60] sm:$0xff] }
 0x1d5   : > { %693 = vrot.lane.b32.xlu1 %v3167_v58, %s2958_s14 }
 0x1d6   : > { %634 = vrot.lane.b32.xlu0 %v602_v59, %s2956_s12 }
 0x1d9   : > { %695 = vrot.lane.b32.xlu1 %v3172_v60, %s2958_s14 }
 0x1da   : > { %564 = vrot.lane.b32.xlu0 %v531_v61, %s2957_s13 }
 0x1dd   : > { %636 = vrot.lane.b32.xlu1 %v603_v62, %s2956_s12 }
 0x1de   : > { %566 = vrot.lane.b32.xlu0 %v532_v63, %s2957_s13 }
 0x1e1   : > { %697 = vrot.lane.b32.xlu1 %v3179_v1, %s2958_s14 }
 0x1e2   : > { %638 = vrot.lane.b32.xlu0 %v604_v2, %s2956_s12 }
 0x1e5   : > { %640 = vrot.lane.b32.xlu1 %v605_v4, %s2956_s12 }
 0x1e6   : > { %568 = vrot.lane.b32.xlu0 %v533_v5, %s2957_s13 }
 0x1e9   : > { %701 = vrot.lane.b32.xlu1 %v666_v8, %s2958_s14 }
 0x1ea   : > { %699 = vrot.lane.b32.xlu0 %v3189_v9, %s2958_s14 }
 0x217   : > { %v619_v12 = vpop.permute.xlu1 %618 }
 0x218   : > { %v547_v14 = vpop.permute.xlu0 %546 }
 0x219   : > { %v582_v15 = vadd.f32 %v547_v14, %v510_v13 }
 0x21b   : > { %v654_v16 = vadd.f32 %v619_v12, %v582_v15  ;;  %v680_v18 = vpop.permute.xlu1 %679 }
 0x21c   : > { %v549_v20 = vpop.permute.xlu0 %548 }
 0x21d   : > { %v715_v21 = vadd.f32 %v680_v18, %v654_v16  ;;  %v583_v26 = vadd.f32 %v549_v20, %v3115_v19 }
 0x21f   : > { %v732_v22 = vadd.f32 %v3197_v17, %v715_v21  ;;  %v621_v23 = vpop.permute.xlu1 %620 }
 0x220   : > { %v551_v24 = vpop.permute.xlu0 %550  ;;  %v655_v28 = vadd.f32 %v621_v23, %v583_v26 }
 0x221   : > { %v744_v25 = vmax.f32 %v732_v22, 0.0  ;;  %v584_v32 = vadd.f32 %v551_v24, %v3124_v27 }
 0x223   : > { %2703 = vmatprep.mubr.msk.f32.mxu1 %vm769_vm5, %v744_v25  ;;  %v682_v29 = vpop.permute.xlu1 %681 }
 0x224   : > { %v623_v31 = vpop.permute.xlu0 %622  ;;  %v716_v33 = vadd.f32 %v682_v29, %v655_v28 }
 0x225   : > { %v656_v35 = vadd.f32 %v623_v31, %v584_v32 }
 0x226   : > { %v733_v34 = vadd.f32 %v3197_v17, %v716_v33 }
 0x227   : > { %v684_v36 = vpop.permute.xlu1 %683 }
 0x228   : > { %v553_v37 = vpop.permute.xlu0 %552  ;;  %v745_v39 = vmax.f32 %v733_v34, 0.0  ;;  %v717_v40 = vadd.f32 %v684_v36, %v656_v35 }
 0x229   : > { %v585_v45 = vadd.f32 %v553_v37, %v3130_v30 }
 0x22a   : > { %v734_v41 = vadd.f32 %v3197_v17, %v717_v40  ;;  %2704 = vmatmul.mubr.msk.f32.vlgmr.msra.gmra.mxu1 %vm769_vm5, %v745_v39 }
 0x22b   : > { %v625_v19 = vpop.permute.xlu1 %624 }
 0x22c   : > { %v555_v43 = vpop.permute.xlu0 %554  ;;  %v746_v44 = vmax.f32 %v734_v41, 0.0  ;;  %v657_v46 = vadd.f32 %v625_v19, %v585_v45 }
 0x22d   : > { %v586_v48 = vadd.f32 %v555_v43, %v3139_v38 }
 0x22e   : > { %2706 = vmatprep.mubr.msk.f32.mxu1 %vm769_vm5, %v746_v44 }
 0x22f   : > { %v686_v27 = vpop.permute.xlu1 %685 }
 0x230   : > { %v627_v47 = vpop.permute.xlu0 %626  ;;  %v718_v49 = vadd.f32 %v686_v27, %v657_v46 }
 0x231   : > { %v658_v52 = vadd.f32 %v627_v47, %v586_v48 }
 0x232   : > { %v735_v51 = vadd.f32 %v3197_v17, %v718_v49 }
 0x233   : > { %v688_v53 = vpop.permute.xlu1 %687 }
 0x234   : > { %v557_v55 = vpop.permute.xlu0 %556  ;;  %v747_v56 = vmax.f32 %v735_v51, 0.0  ;;  %v719_v57 = vadd.f32 %v688_v53, %v658_v52  ;;  %v932_v53 = vld [vmem:[%s2991_s11 + $0x160] sm:$0xff] }
 0x235   : > { %v587_v63 = vadd.f32 %v557_v55, %v3145_v42  ;;  %v931_v55 = vld [vmem:[%s2991_s11 + $0x158] sm:$0xff] }
 0x236   : > { %v736_v59 = vadd.f32 %v3197_v17, %v719_v57  ;;  %2707 = vmatmul.mubr.msk.f32.gmra.mxu1 %vm769_vm5, %v747_v56  ;;  %v758_v57 = vld [vmem:[%s2991_s11 + $0x100] sm:$0xff] }
 0x237   : > { %v629_v30 = vpop.permute.xlu1 %628 }
 0x238   : > { %v559_v61 = vpop.permute.xlu0 %558  ;;  %v748_v62 = vmax.f32 %v736_v59, 0.0  ;;  %v659_v2 = vadd.f32 %v629_v30, %v587_v63  ;;  %v759_v63 = vld [vmem:[%s2991_s11 + $0x108] sm:$0xff] }
 0x239   : > { %v588_v4 = vadd.f32 %v559_v61, %v3154_v50 }
 0x23a   : > { %2709 = vmatprep.mubr.msk.f32.mxu1 %vm769_vm5, %v748_v62 }
 0x23b   : > { %v690_v38 = vpop.permute.xlu1 %689 }
 0x23c   : > { %v631_v3 = vpop.permute.xlu0 %630  ;;  %v720_v5 = vadd.f32 %v690_v38, %v659_v2  ;;  %v760_v2 = vld [vmem:[%s2991_s11 + $0x110] sm:$0xff] }
 0x23d   : > { %v660_v7 = vadd.f32 %v631_v3, %v588_v4 }
 0x23e   : > { %v737_v6 = vadd.f32 %v3197_v17, %v720_v5 }
 0x23f   : > { %v692_v8 = vpop.permute.xlu1 %691 }
 0x240   : > { %v561_v10 = vpop.permute.xlu0 %560  ;;  %v749_v11 = vmax.f32 %v737_v6, 0.0  ;;  %v721_v12 = vadd.f32 %v692_v8, %v660_v7  ;;  %v761_v6 = vld [vmem:[%s2991_s11 + $0x118] sm:$0xff]  ;;  %v762_v7 = vld [vmem:[%s2991_s11 + $0x120] sm:$0xff] }
 0x241   : > { %v589_v16 = vadd.f32 %v561_v10, %v3160_v54 }
 0x242   : > { %v738_v13 = vadd.f32 %v3197_v17, %v721_v12  ;;  %2710 = vmatmul.mubr.msk.f32.gmra.mxu1 %vm769_vm5, %v749_v11 }
 0x243   : > { %v633_v42 = vpop.permute.xlu1 %632 }
 0x244   : > { %v563_v14 = vpop.permute.xlu0 %562  ;;  %v750_v15 = vmax.f32 %v738_v13, 0.0  ;;  %v661_v18 = vadd.f32 %v633_v42, %v589_v16  ;;  %v763_v13 = vld [vmem:[%s2991_s11 + $0x128] sm:$0xff]  ;;  %v764_v42 = vld [vmem:[%s2991_s11 + $0x130] sm:$0xff] }
 0x245   : > { %v590_v21 = vadd.f32 %v563_v14, %v3167_v58 }
 0x246   : > { %2712 = vmatprep.mubr.msk.f32.mxu1 %vm769_vm5, %v750_v15 }
 0x247   : > { %v694_v50 = vpop.permute.xlu1 %693 }
 0x248   : > { %v635_v20 = vpop.permute.xlu0 %634  ;;  %v722_v22 = vadd.f32 %v694_v50, %v661_v18  ;;  %v765_v50 = vld [vmem:[%s2991_s11 + $0x138] sm:$0xff] }
 0x249   : > { %v662_v24 = vadd.f32 %v635_v20, %v590_v21  ;;  %v766_v20 = vld [vmem:[%s2991_s11 + $0x140] sm:$0xff] }
 0x24a   : > { %v739_v23 = vadd.f32 %v3197_v17, %v722_v22 }
 0x24b   : > { %v696_v25 = vpop.permute.xlu1 %695 }
 0x24c   : > { %v565_v26 = vpop.permute.xlu0 %564  ;;  %v751_v28 = vmax.f32 %v739_v23, 0.0  ;;  %v723_v29 = vadd.f32 %v696_v25, %v662_v24  ;;  %v767_v25 = vld [vmem:[%s2991_s11 + $0x148] sm:$0xff] }
 0x24d   : > { %v591_v34 = vadd.f32 %v565_v26, %v3172_v60  ;;  %v768_v26 = vld [vmem:[%s2991_s11 + $0x150] sm:$0xff] }
 0x24e   : > { %v740_v31 = vadd.f32 %v3197_v17, %v723_v29  ;;  %2713 = vmatmul.mubr.msk.f32.gmra.mxu1 %vm769_vm5, %v751_v28 }
 0x24f   : > { %v637_v54 = vpop.permute.xlu1 %636 }
 0x250   : > { %v567_v32 = vpop.permute.xlu0 %566  ;;  %v752_v33 = vmax.f32 %v740_v31, 0.0  ;;  %v663_v35 = vadd.f32 %v637_v54, %v591_v34  ;;  %v1121_v54 = vld [vmem:[%s2991_s11 + $0x1b8] sm:$0xff]  ;;  %v1118_v34 = vld [vmem:[%s2991_s11 + $0x1a0] sm:$0xff] }
 0x251   : > { %v592_v19 = vadd.f32 %v567_v32, %v3179_v1  ;;  %2755 = vmatprep.subr.mxu1 %v1121_v54  ;;  %v1120_v32 = vld [vmem:[%s2991_s11 + $0x1b0] sm:$0xff] }
 0x252   : > { %2715 = vmatprep.mubr.msk.f32.mxu1 %vm769_vm5, %v752_v33  ;;  %2756 = vmatpush3.msra.mxu1 %v1121_v54  ;;  %v1119_v33 = vld [vmem:[%s2991_s11 + $0x1a8] sm:$0xff] }
 0x253   : > { %v698_v58 = vpop.permute.xlu1 %697  ;;  %2757 = vmatprep.subr.mxu1 %v1120_v32 }
 0x254   : > { %v639_v36 = vpop.permute.xlu0 %638  ;;  %v724_v37 = vadd.f32 %v698_v58, %v663_v35  ;;  %2758 = vmatpush3.msra.mxu1 %v1120_v32  ;;  %v1295_v35 = vld [vmem:[%s2991_s11 + $0x200] sm:$0xff]  ;;  %v1294_v58 = vld [vmem:[%s2991_s11 + $0x1f8] sm:$0xff] }
 0x255   : > { %v664_v45 = vadd.f32 %v639_v36, %v592_v19  ;;  %2759 = vmatprep.subr.mxu1 %v1119_v33  ;;  %v1293_v36 = vld [vmem:[%s2991_s11 + $0x1f0] sm:$0xff] }
 0x256   : > { %v741_v39 = vadd.f32 %v3197_v17, %v724_v37  ;;  %2760 = vmatpush3.msra.mxu1 %v1119_v33  ;;  %v1292_v37 = vld [vmem:[%s2991_s11 + $0x1e8] sm:$0xff] }
 0x257   : > { %v641_v40 = vpop.permute.xlu1 %640  ;;  %2761 = vmatprep.subr.mxu1 %v1118_v34 }
 0x258   : > { %v569_v41 = vpop.permute.xlu0 %568  ;;  %v753_v43 = vmax.f32 %v741_v39, 0.0  ;;  %2762 = vmatpush3.msra.mxu1 %v1118_v34  ;;  %v1291_v39 = vld [vmem:[%s2991_s11 + $0x1e0] sm:$0xff] }
 0x259   : > { %v593_v44 = vadd.f32 %v569_v41, %v3189_v9  ;;  %v933_v9 = vld [vmem:[%s2991_s11 + $0x168] sm:$0xff] }
 0x25a   : > { %2716 = vmatmul.mubr.msk.f32.gmra.mxu1 %vm769_vm5, %v753_v43  ;;  %2731 = vmatprep.subr.mxu0 %v933_v9 }
 0x25b   : > { %v665_v60 = vadd.f32 %v641_v40, %v593_v44  ;;  %v702_v46 = vpop.permute.xlu1 %701  ;;  %2732 = vmatpush3.msra.mxu0 %v933_v9  ;;  %v2402_v40 = vld [vmem:[%s2991_s11 + $0x198] ss:$0 sm:$0xff] }
 0x25c   : > { %v700_v27 = vpop.permute.xlu0 %699  ;;  %2733 = vmatprep.subr.mxu0 %v932_v53 }
 0x25d   : > { %v726_v47 = vadd.f32 %v702_v46, %v665_v60  ;;  %v725_v48 = vadd.f32 %v700_v27, %v664_v45  ;;  %2734 = vmatpush3.msra.mxu0 %v932_v53 }
 0x25e   : > { %2735 = vmatprep.subr.mxu0 %v931_v55 }
 0x25f   : > { %v743_v49 = vadd.f32 %v3197_v17, %v726_v47  ;;  %v742_v51 = vadd.f32 %v3197_v17, %v725_v48  ;;  %2736 = vmatpush3.msra.mxu0 %v931_v55  ;;  %v757_v17 = vld [vmem:[%s2991_s11 + $0xf8] sm:$0xff] }
 0x260   : > { %2781 = vmatprep.subr.mxu0 %v1295_v35 }
 0x261   : > { %v755_v1 = vmax.f32 %v743_v49, 0.0  ;;  %v754_v52 = vmax.f32 %v742_v51, 0.0 }
 0x263   : > { %2718 = vmatprep.mubr.msk.f32.mxu1 %vm769_vm5, %v754_v52 }
 0x264   : > { %2719 = vmatmul.mubr.msk.f32.gmra.mxu1 %vm769_vm5, %v755_v1 }
 0x2ea   : > { %v2705_v56 = vpop.f32.mrf.mxu1 }
 0x2eb   : > { %v878_v61 = vadd.f32 %v2705_v56, %v758_v57 }
 0x2ec   : > { %v872_v59 = vpop.f32.mrf.mxu1 }
 0x2ed   : > { %v873_v30 = vadd.f32 %v872_v59, %v757_v17 }
 0x2ef   : > { %2737 = vmatprep.mubr.msk.f32.mxu0 %vm944_vm6, %v873_v30 }
 0x2f0   : > { %2738 = vmatmul.mubr.msk.f32.vlgmr.msra.gmra.mxu0 %vm944_vm6, %v878_v61 }
 0x2f1   : > { %2782 = vmatpush3.msra.mxu0 %v1295_v35 }
 0x2f2   : > { %2783 = vmatprep.subr.mxu0 %v1294_v58 }
 0x2f3   : > { %2784 = vmatpush3.msra.mxu0 %v1294_v58 }
 0x2f4   : > { %2785 = vmatprep.subr.mxu0 %v1293_v36 }
 0x2f5   : > { %2786 = vmatpush3.msra.mxu0 %v1293_v36 }
 0x2f6   : > { %v2708_v62 = vpop.f32.mrf.mxu1  ;;  %2787 = vmatprep.subr.mxu0 %v1292_v37 }
 0x2f7   : > { %v888_v4 = vadd.f32 %v2708_v62, %v760_v2  ;;  %2788 = vmatpush3.msra.mxu0 %v1292_v37 }
 0x2f8   : > { %v882_v38 = vpop.f32.mrf.mxu1  ;;  %2789 = vmatprep.subr.mxu0 %v1291_v39 }
 0x2f9   : > { %v883_v3 = vadd.f32 %v882_v38, %v759_v63  ;;  %2790 = vmatpush3.msra.mxu0 %v1291_v39 }
 0x2fb   : > { %2740 = vmatprep.mubr.msk.f32.mxu0 %vm944_vm6, %v883_v3 }
 0x2fc   : > { %2741 = vmatmul.mubr.msk.f32.gmra.mxu0 %vm944_vm6, %v888_v4 }
 0x302   : > { %v2711_v5 = vpop.f32.mrf.mxu1 }
 0x303   : > { %v898_v11 = vadd.f32 %v2711_v5, %v762_v7 }
 0x304   : > { %v892_v8 = vpop.f32.mrf.mxu1 }
 0x305   : > { %v893_v10 = vadd.f32 %v892_v8, %v761_v6 }
 0x307   : > { %2743 = vmatprep.mubr.msk.f32.mxu0 %vm944_vm6, %v893_v10 }
 0x308   : > { %2744 = vmatmul.mubr.msk.f32.gmra.mxu0 %vm944_vm6, %v898_v11 }
 0x30e   : > { %v2714_v12 = vpop.f32.mrf.mxu1 }
 0x30f   : > { %v908_v16 = vadd.f32 %v2714_v12, %v764_v42  ;;  %v1289_v42 = vld [vmem:[%s2991_s11 + $0x1d0] sm:$0xff] }
 0x310   : > { %v902_v14 = vpop.f32.mrf.mxu1 }
 0x311   : > { %v903_v15 = vadd.f32 %v902_v14, %v763_v13  ;;  %v1290_v13 = vld [vmem:[%s2991_s11 + $0x1d8] sm:$0xff]  ;;  %v1288_v14 = vld [vmem:[%s2991_s11 + $0x1c8] sm:$0xff] }
 0x312   : > { %2791 = vmatprep.subr.mxu0 %v1290_v13 }
 0x313   : > { %2746 = vmatprep.mubr.msk.f32.mxu0 %vm944_vm6, %v903_v15  ;;  %2792 = vmatpush3.msra.mxu0 %v1290_v13 }
 0x314   : > { %2747 = vmatmul.mubr.msk.f32.gmra.mxu0 %vm944_vm6, %v908_v16  ;;  %2793 = vmatprep.subr.mxu0 %v1289_v42  ;;  %v2415_v16 = vld [vmem:[%s2991_s11 + $0x1c0] ss:$0 sm:$0xff] }
 0x315   : > { %2794 = vmatpush3.msra.mxu0 %v1289_v42 }
 0x316   : > { %2795 = vmatprep.subr.mxu0 %v1288_v14 }
 0x317   : > { %2796 = vmatpush3.msra.mxu0 %v1288_v14 }
 0x318   : > { %2841 = vmatprep.subr.mxu0 %v2954_v0 }
 0x31a   : > { %v2717_v18 = vpop.f32.mrf.mxu1 }
 0x31b   : > { %v918_v23 = vadd.f32 %v2717_v18, %v766_v20 }
 0x31c   : > { %v912_v21 = vpop.f32.mrf.mxu1 }
 0x31d   : > { %v913_v22 = vadd.f32 %v912_v21, %v765_v50 }
 0x31f   : > { %2749 = vmatprep.mubr.msk.f32.mxu0 %vm944_vm6, %v913_v22 }
 0x320   : > { %2750 = vmatmul.mubr.msk.f32.gmra.mxu0 %vm944_vm6, %v918_v23 }
 0x324   : > { %v2720_v24 = vpop.f32.mrf.mxu1 }
 0x325   : > { %v928_v31 = vadd.f32 %v2720_v24, %v768_v26 }
 0x326   : > { %v922_v28 = vpop.f32.mrf.mxu1 }
 0x327   : > { %v923_v29 = vadd.f32 %v922_v28, %v767_v25 }
 0x329   : > { %2752 = vmatprep.mubr.msk.f32.mxu0 %vm944_vm6, %v923_v29 }
 0x32a   : > { %2753 = vmatmul.mubr.msk.f32.gmra.mxu0 %vm944_vm6, %v928_v31 }
 0x3b0   : > { %v2739_v41 = vpop.f32.mrf.mxu0 }
 0x3b1   : > { %v1053_v19 = vadd.f32 %v2739_v41, %v2402_v40 }
 0x3b2   : > { %v1047_v43 = vpop.f32.mrf.mxu0 }
 0x3b3   : > { %v1048_v44 = vadd.f32 %v2402_v40, %v1047_v43  ;;  %v1107_v60 = vmax.f32 %v1053_v19, 0.0  ;;  %v1477_v19 = vld [vmem:[%s2991_s11 + $0x228] sm:$0xff]  ;;  %v1476_v43 = vld [vmem:[%s2991_s11 + $0x220] sm:$0xff] }
 0x3b4   : > { %2815 = vmatprep.subr.mxu1 %v1477_v19 }
 0x3b5   : > { %v1106_v45 = vmax.f32 %v1048_v44, 0.0  ;;  %v1475_v44 = vld [vmem:[%s2991_s11 + $0x218] sm:$0xff] }
 0x3b7   : > { %2763 = vmatprep.mubr.msk.f32.mxu1 %vm3552_vm4, %v1106_v45  ;;  %v1474_v45 = vld [vmem:[%s2991_s11 + $0x210] sm:$0xff] }
 0x3b8   : > { %2764 = vmatmul.mubr.msk.f32.vlgmr.msra.gmra.mxu1 %vm3552_vm4, %v1107_v60  ;;  %v1644_v60 = vld [vmem:[%s2991_s11 + $0x68] sm:$0xff] }
 0x3b9   : > { %2816 = vmatpush3.msra.mxu1 %v1477_v19  ;;  %vm1656_vm7 = vcmp.gt.f32.partialorder %v1644_v60, 0.5  ;;  %v1878_v60 = vld [vmem:[%s2991_s11 + $0x270] sm:$0xff] }
 0x3ba   : > { %2817 = vmatprep.subr.mxu1 %v1476_v43 }
 0x3bb   : > { %2818 = vmatpush3.msra.mxu1 %v1476_v43 }
 0x3bc   : > { %v2742_v46 = vpop.f32.mrf.mxu0  ;;  %2819 = vmatprep.subr.mxu1 %v1475_v44 }
 0x3bd   : > { %v1063_v27 = vadd.f32 %v2742_v46, %v2402_v40  ;;  %2820 = vmatpush3.msra.mxu1 %v1475_v44  ;;  %v2959_v46 = vmov 0  }
 0x3be   : > { %v1057_v47 = vpop.f32.mrf.mxu0  ;;  %2821 = vmatprep.subr.mxu1 %v1474_v45  ;;  %2940 = vset.pattern.permute.xlu0 %v2959_v46 }
 0x3bf   : > { %v1058_v48 = vadd.f32 %v2402_v40, %v1057_v47  ;;  %v1109_v51 = vmax.f32 %v1063_v27, 0.0  ;;  %2822 = vmatpush3.msra.mxu1 %v1474_v45  ;;  %v1668_v27 = vsel %vm1656_vm7, 1, %v2959_v46  ;;  %2941 = vset.pattern.permute.xlu1 %v2959_v46  ;;  %v1647_v47 = vld [vmem:[%s2991_s11 + $0x80] sm:$0xff] }
 0x3c0   : > { %2871 = vmatprep.subr.mxu1 %v2954_v0  ;;  %1681 = vperm.xlu0 %2940, %v1668_v27   ;;  %vm1659_vm8 = vcmp.gt.f32.partialorder %v1647_v47, 0.5  ;;  %v1875_v47 = vld [vmem:[%s2991_s11 + $0x258] sm:$0xff] }
 0x3c1   : > { %v1108_v49 = vmax.f32 %v1058_v48, 0.0  ;;  %v1671_v48 = vsel %vm1659_vm8, 1, %v2959_v46 }
 0x3c3   : > { %2766 = vmatprep.mubr.msk.f32.mxu1 %vm3552_vm4, %v1108_v49  ;;  %v1649_v49 = vld [vmem:[%s2991_s11 + $0x90] sm:$0xff] }
 0x3c4   : > { %2767 = vmatmul.mubr.msk.f32.gmra.mxu1 %vm3552_vm4, %v1109_v51  ;;  %1690 = vperm.xlu0 %2940, %v1671_v48   ;;  %vm1661_vm9 = vcmp.gt.f32.partialorder %v1649_v49, 0.5  ;;  %v1873_v49 = vld [vmem:[%s2991_s11 + $0x248] sm:$0xff] }
 0x3c5   : > { %v1673_v51 = vsel %vm1661_vm9, 1, %v2959_v46 }
 0x3c8   : > { %v2745_v1 = vpop.f32.mrf.mxu0  ;;  %1696 = vperm.xlu0 %2940, %v1673_v51  }
 0x3c9   : > { %v1073_v52 = vadd.f32 %v2745_v1, %v2402_v40  ;;  %v1645_v1 = vld [vmem:[%s2991_s11 + $0x70] sm:$0xff] }
 0x3ca   : > { %v1067_v9 = vpop.f32.mrf.mxu0  ;;  %vm1657_vm10 = vcmp.gt.f32.partialorder %v1645_v1, 0.5  ;;  %v1871_v1 = vld [vmem:[%s2991_s11 + $0x238] sm:$0xff] }
 0x3cb   : > { %v1068_v53 = vadd.f32 %v2402_v40, %v1067_v9  ;;  %v1111_v56 = vmax.f32 %v1073_v52, 0.0  ;;  %v1669_v52 = vsel %vm1657_vm10, 1, %v2959_v46  ;;  %v1651_v9 = vld [vmem:[%s2991_s11 + $0xa0] sm:$0xff] }
 0x3cc   : > { %1684 = vperm.xlu1 %2941, %v1669_v52   ;;  %vm1663_vm11 = vcmp.gt.f32.partialorder %v1651_v9, 0.5 }
 0x3cd   : > { %v1110_v55 = vmax.f32 %v1068_v53, 0.0  ;;  %v1675_v53 = vsel %vm1663_vm11, 1, %v2959_v46 }
 0x3ce   : > { %1702 = vperm.xlu0 %2940, %v1675_v53  }
 0x3cf   : > { %2769 = vmatprep.mubr.msk.f32.mxu1 %vm3552_vm4, %v1110_v55  ;;  %v1646_v55 = vld [vmem:[%s2991_s11 + $0x78] sm:$0xff] }
 0x3d0   : > { %2770 = vmatmul.mubr.msk.f32.gmra.mxu1 %vm3552_vm4, %v1111_v56  ;;  %vm1658_vm12 = vcmp.gt.f32.partialorder %v1646_v55, 0.5  ;;  %v1652_v56 = vld [vmem:[%s2991_s11 + $0xa8] sm:$0xff] }
 0x3d1   : > { %vm1664_vm13 = vcmp.gt.f32.partialorder %v1652_v56, 0.5 }
 0x3d4   : > { %v2748_v17 = vpop.f32.mrf.mxu0 }
 0x3d5   : > { %v1083_v57 = vadd.f32 %v2748_v17, %v2402_v40  ;;  %v1648_v17 = vld [vmem:[%s2991_s11 + $0x88] sm:$0xff] }
 0x3d6   : > { %v1077_v59 = vpop.f32.mrf.mxu0  ;;  %vm1660_vm14 = vcmp.gt.f32.partialorder %v1648_v17, 0.5 }
 0x3d7   : > { %v1078_v30 = vadd.f32 %v2402_v40, %v1077_v59  ;;  %v1113_v62 = vmax.f32 %v1083_v57, 0.0  ;;  %v1655_v57 = vld [vmem:[%s2991_s11 + $0xc0] sm:$0xff]  ;;  %v1670_v59 = vsel %vm1658_vm12, 1, %v2959_v46 }
 0x3d8   : > { %1687 = vperm.xlu1 %2941, %v1670_v59   ;;  %vm1667_vm15 = vcmp.gt.f32.partialorder %v1655_v57, 0.5 }
 0x3d9   : > { %v1112_v61 = vmax.f32 %v1078_v30, 0.0  ;;  %v1650_v30 = vld [vmem:[%s2991_s11 + $0x98] sm:$0xff] }
 0x3da   : > { %vm1662_vm2 = vcmp.gt.f32.partialorder %v1650_v30, 0.5 }
 0x3db   : > { %2772 = vmatprep.mubr.msk.f32.mxu1 %vm3552_vm4, %v1112_v61  ;;  %v1676_v61 = vsel %vm1664_vm13, 1, %v2959_v46 }
 0x3dc   : > { %2773 = vmatmul.mubr.msk.f32.gmra.mxu1 %vm3552_vm4, %v1113_v62  ;;  %v1672_v62 = vsel %vm1660_vm14, 1, %v2959_v46  ;;  %1705 = vperm.xlu0 %2940, %v1676_v61  }
 0x3dd   : > { %1693 = vperm.xlu1 %2941, %v1672_v62  }
 0x3e0   : > { %v2751_v63 = vpop.f32.mrf.mxu0 }
 0x3e1   : > { %v1093_v2 = vadd.f32 %v2751_v63, %v2402_v40  ;;  %v1679_v63 = vsel %vm1667_vm15, 1, %v2959_v46 }
 0x3e2   : > { %v1087_v38 = vpop.f32.mrf.mxu0  ;;  %1714 = vperm.xlu0 %2940, %v1679_v63  }
 0x3e3   : > { %v1088_v3 = vadd.f32 %v2402_v40, %v1087_v38  ;;  %v1115_v5 = vmax.f32 %v1093_v2, 0.0  ;;  %v1674_v2 = vsel %vm1662_vm2, 1, %v2959_v46  ;;  %v2960_v38 = vmov 1  }
 0x3e4   : > { %1699 = vperm.xlu1 %2941, %v1674_v2  }
 0x3e5   : > { %v1114_v4 = vmax.f32 %v1088_v3, 0.0  ;;  %v1653_v3 = vld [vmem:[%s2991_s11 + $0xb0] sm:$0xff] }
 0x3e6   : > { %2944 = vset.pattern.permute.xlu0 %v2960_v38  ;;  %vm1665_vm3 = vcmp.gt.f32.partialorder %v1653_v3, 0.5 }
 0x3e7   : > { %2775 = vmatprep.mubr.msk.f32.mxu1 %vm3552_vm4, %v1114_v4  ;;  %1773 = vperm.xlu0 %2944, %v1669_v52   ;;  %v1677_v4 = vsel %vm1665_vm3, 1, %v2959_v46 }
 0x3e8   : > { %2776 = vmatmul.mubr.msk.f32.gmra.mxu1 %vm3552_vm4, %v1115_v5  ;;  %2942 = vset.pattern.permute.xlu1 %v2960_v38  ;;  %v1654_v5 = vld [vmem:[%s2991_s11 + $0xb8] sm:$0xff] }
 0x3e9   : > { %1770 = vperm.xlu1 %2942, %v1668_v27   ;;  %vm1666_vm5 = vcmp.gt.f32.partialorder %v1654_v5, 0.5  ;;  %v1876_v27 = vld [vmem:[%s2991_s11 + $0x260] sm:$0xff] }
 0x3ea   : > { %v2754_v6 = vpop.f32.mrf.mxu0 }
 0x3eb   : > { %v1103_v7 = vadd.f32 %v2754_v6, %v2402_v40  ;;  %1782 = vperm.xlu0 %2944, %v1672_v62   ;;  %v1678_v6 = vsel %vm1666_vm5, 1, %v2959_v46 }
 0x3ec   : > { %v1097_v8 = vpop.f32.mrf.mxu0 }
 0x3ed   : > { %v1098_v10 = vadd.f32 %v2402_v40, %v1097_v8  ;;  %v1117_v12 = vmax.f32 %v1103_v7, 0.0  ;;  %1776 = vperm.xlu1 %2942, %v1670_v59   ;;  %v2428_v7 = vld [vmem:[%s2991_s11 + $0x208] ss:$0 sm:$0xff] }
 0x3ef   : > { %v1116_v11 = vmax.f32 %v1098_v10, 0.0  ;;  %1788 = vperm.xlu0 %2944, %v1674_v2  }
 0x3f1   : > { %2778 = vmatprep.mubr.msk.f32.mxu1 %vm3552_vm4, %v1116_v11  ;;  %1779 = vperm.xlu1 %2942, %v1671_v48   ;;  %v1874_v48 = vld [vmem:[%s2991_s11 + $0x250] sm:$0xff] }
 0x3f2   : > { %2779 = vmatmul.mubr.msk.f32.gmra.mxu1 %vm3552_vm4, %v1117_v12 }
 0x3f3   : > { %1797 = vperm.xlu0 %2944, %v1677_v4  }
 0x3f5   : > { %1785 = vperm.xlu1 %2942, %v1673_v51   ;;  %v1872_v51 = vld [vmem:[%s2991_s11 + $0x240] sm:$0xff] }
 0x3f9   : > { %1791 = vperm.xlu1 %2942, %v1675_v53  }
 0x3fd   : > { %2943 = vset.pattern.permute.xlu1 %v2959_v46  ;;  %v1877_v46 = vld [vmem:[%s2991_s11 + $0x268] sm:$0xff] }
 0x3fe   : > { %1708 = vperm.xlu1 %2943, %v1677_v4  }
 0x402   : > { %1711 = vperm.xlu1 %2943, %v1678_v6  }
 0x406   : > { %2945 = vset.pattern.permute.xlu1 %v2960_v38 }
 0x407   : > { %1794 = vperm.xlu1 %2945, %v1676_v61  }
 0x40b   : > { %1800 = vperm.xlu1 %2945, %v1678_v6  }
 0x40f   : > { %1803 = vperm.xlu1 %2945, %v1679_v63  }
 0x43b   : > { %v1682_v56 = vpop.permute.xlu0 %1681 }
 0x43c   : > { %vm1716_vm7 = vcmp.eq.s32.totalorder %v1682_v56, 1 }
 0x43f   : > { %v3356_v57 = vpop.permute.xlu0 %1690 }
 0x440   : > { %vm1719_vm8 = vcmp.eq.s32.totalorder %v3356_v57, 1 }
 0x443   : > { %v3360_v30 = vpop.permute.xlu0 %1696 }
 0x444   : > { %vm1721_vm9 = vcmp.eq.s32.totalorder %v3360_v30, 1 }
 0x447   : > { %v1685_v52 = vpop.permute.xlu1 %1684 }
 0x448   : > { %vm1717_vm10 = vcmp.eq.s32.totalorder %v1685_v52, 1 }
 0x449   : > { %v3362_v62 = vpop.permute.xlu0 %1702 }
 0x453   : > { %v3350_v9 = vpop.permute.xlu1 %1687 }
 0x454   : > { %vm1718_vm13 = vcmp.eq.s32.totalorder %v3350_v9, 1 }
 0x457   : > { %v3366_v2 = vpop.permute.xlu0 %1705 }
 0x458   : > { %v3352_v53 = vpop.permute.xlu1 %1693  ;;  %vm1724_vm12 = vcmp.eq.s32.totalorder %v3366_v2, 1 }
 0x459   : > { %vm1720_vm14 = vcmp.eq.s32.totalorder %v3352_v53, 1 }
 0x45d   : > { %v3372_v5 = vpop.permute.xlu0 %1714 }
 0x45f   : > { %v3354_v55 = vpop.permute.xlu1 %1699 }
 0x460   : > { %vm1722_vm1 = vcmp.eq.s32.totalorder %v3354_v55, 1 }
 0x464   : > { %v1771_v17 = vpop.permute.xlu1 %1770 }
 0x465   : > { %vm1805_vm15 = vcmp.eq.s32.totalorder %v1771_v17, 1 }
 0x468   : > { %v3358_v59 = vpop.permute.xlu1 %1776 }
 0x469   : > { %vm1807_vm2 = vcmp.eq.s32.totalorder %v3358_v59, 1 }
 0x46c   : > { %v1780_v61 = vpop.permute.xlu1 %1779 }
 0x46d   : > { %vm1808_vm3 = vcmp.eq.s32.totalorder %v1780_v61, 1 }
 0x470   : > { %v3364_v63 = vpop.permute.xlu1 %1785 }
 0x471   : > { %vm1810_vm5 = vcmp.eq.s32.totalorder %v3364_v63, 1 }
 0x474   : > { %v3368_v38 = vpop.permute.xlu1 %1791 }
 0x478   : > { %v2765_v15 = vpop.f32.mrf.mxu1 }
 0x479   : > { %v1235_v20 = vadd.f32 %v2765_v15, %v2415_v16  ;;  %v3370_v4 = vpop.permute.xlu1 %1708 }
 0x47a   : > { %v1229_v18 = vpop.f32.mrf.mxu1 }
 0x47b   : > { %v1230_v50 = vadd.f32 %v2415_v16, %v1229_v18 }
 0x47d   : > { %2797 = vmatprep.mubr.msk.f32.mxu0 %vm944_vm6, %v1230_v50 }
 0x47e   : > { %2798 = vmatmul.mubr.msk.f32.vlgmr.msra.gmra.mxu0 %vm944_vm6, %v1235_v20 }
 0x47f   : > { %2842 = vmatpush3.msra.mxu0 %v1878_v60 }
 0x480   : > { %2843 = vmatprep.subr.mxu0 %v2954_v0 }
 0x481   : > { %2844 = vmatpush3.msra.mxu0 %v1877_v46 }
 0x482   : > { %2845 = vmatprep.subr.mxu0 %v2954_v0 }
 0x483   : > { %2846 = vmatpush3.msra.mxu0 %v1876_v27 }
 0x484   : > { %v2768_v21 = vpop.f32.mrf.mxu1  ;;  %2847 = vmatprep.subr.mxu0 %v2954_v0 }
 0x485   : > { %v1245_v24 = vadd.f32 %v2768_v21, %v2415_v16  ;;  %2848 = vmatpush3.msra.mxu0 %v1875_v47 }
 0x486   : > { %v1239_v22 = vpop.f32.mrf.mxu1  ;;  %2849 = vmatprep.subr.mxu0 %v2954_v0 }
 0x487   : > { %v1240_v23 = vadd.f32 %v2415_v16, %v1239_v22  ;;  %2850 = vmatpush3.msra.mxu0 %v1874_v48 }
 0x488   : > { %2851 = vmatprep.subr.mxu0 %v2954_v0 }
 0x489   : > { %2800 = vmatprep.mubr.msk.f32.mxu0 %vm944_vm6, %v1240_v23  ;;  %2852 = vmatpush3.msra.mxu0 %v1873_v49 }
 0x48a   : > { %2801 = vmatmul.mubr.msk.f32.gmra.mxu0 %vm944_vm6, %v1245_v24  ;;  %2853 = vmatprep.subr.mxu0 %v2954_v0 }
 0x48b   : > { %2854 = vmatpush3.msra.mxu0 %v1872_v51 }
 0x48c   : > { %2855 = vmatprep.subr.mxu0 %v2954_v0 }
 0x48d   : > { %2856 = vmatpush3.msra.mxu0 %v1871_v1 }
 0x48e   : > { %2860 = vmatprep.subr.mxu0 %v2954_v0 }
 0x490   : > { %v2771_v25 = vpop.f32.mrf.mxu1 }
 0x491   : > { %v1255_v29 = vadd.f32 %v2771_v25, %v2415_v16 }
 0x492   : > { %v1249_v26 = vpop.f32.mrf.mxu1 }
 0x493   : > { %v1250_v28 = vadd.f32 %v2415_v16, %v1249_v26 }
 0x495   : > { %2803 = vmatprep.mubr.msk.f32.mxu0 %vm944_vm6, %v1250_v28 }
 0x496   : > { %2804 = vmatmul.mubr.msk.f32.gmra.mxu0 %vm944_vm6, %v1255_v29 }
 0x49c   : > { %v2774_v31 = vpop.f32.mrf.mxu1 }
 0x49d   : > { %v1265_v33 = vadd.f32 %v2774_v31, %v2415_v16 }
 0x49e   : > { %v1259_v54 = vpop.f32.mrf.mxu1 }
 0x49f   : > { %v1260_v32 = vadd.f32 %v2415_v16, %v1259_v54 }
 0x4a1   : > { %2806 = vmatprep.mubr.msk.f32.mxu0 %vm944_vm6, %v1260_v32 }
 0x4a2   : > { %2807 = vmatmul.mubr.msk.f32.gmra.mxu0 %vm944_vm6, %v1265_v33 }
 0x4a8   : > { %v2777_v34 = vpop.f32.mrf.mxu1 }
 0x4a9   : > { %v1275_v36 = vadd.f32 %v2777_v34, %v2415_v16 }
 0x4aa   : > { %v1269_v35 = vpop.f32.mrf.mxu1 }
 0x4ab   : > { %v1270_v58 = vadd.f32 %v2415_v16, %v1269_v35 }
 0x4ad   : > { %2809 = vmatprep.mubr.msk.f32.mxu0 %vm944_vm6, %v1270_v58 }
 0x4ae   : > { %2810 = vmatmul.mubr.msk.f32.gmra.mxu0 %vm944_vm6, %v1275_v36 }
 0x4b2   : > { %v2780_v37 = vpop.f32.mrf.mxu1 }
 0x4b3   : > { %v1285_v41 = vadd.f32 %v2780_v37, %v2415_v16 }
 0x4b4   : > { %v1279_v39 = vpop.f32.mrf.mxu1 }
 0x4b5   : > { %v1280_v40 = vadd.f32 %v2415_v16, %v1279_v39 }
 0x4b7   : > { %2812 = vmatprep.mubr.msk.f32.mxu0 %vm944_vm6, %v1280_v40 }
 0x4b8   : > { %2813 = vmatmul.mubr.msk.f32.gmra.mxu0 %vm944_vm6, %v1285_v41 }
 0x4b9   : > { %2857 = vmatprep.mubr.msk.f32.mxu0 %vm3553_vm0, %v2954_v0 }
 0x53e   : > { %v2799_v8 = vpop.f32.mrf.mxu0 }
 0x53f   : > { %v1409_v10 = vadd.f32 %v2799_v8, %v2428_v7  ;;  %v3374_v8 = vpop.permute.xlu1 %1711 }
 0x540   : > { %v1403_v11 = vpop.f32.mrf.mxu0 }
 0x541   : > { %v1404_v12 = vadd.f32 %v2428_v7, %v1403_v11  ;;  %v1463_v42 = vmax.f32 %v1409_v10, 0.0  ;;  %v1774_v10 = vpop.permute.xlu0 %1773 }
 0x542   : > { %vm1806_vm11 = vcmp.eq.s32.totalorder %v1774_v10, 1 }
 0x543   : > { %v1462_v13 = vmax.f32 %v1404_v12, 0.0 }
 0x545   : > { %2823 = vmatprep.mubr.msk.f32.mxu1 %vm3552_vm4, %v1462_v13  ;;  %v1783_v12 = vpop.permute.xlu0 %1782 }
 0x546   : > { %2824 = vmatmul.mubr.msk.f32.vlgmr.msra.gmra.mxu1 %vm3552_vm4, %v1463_v42  ;;  %v3376_v42 = vpop.permute.xlu1 %1794 }
 0x54a   : > { %v2802_v14 = vpop.f32.mrf.mxu0 }
 0x54b   : > { %v1419_v15 = vadd.f32 %v2802_v14, %v2428_v7  ;;  %v3379_v14 = vld [vmem:[%s2991_s11 + $0x230] ss:$0 sm:$0xff] }
 0x54c   : > { %v1413_v16 = vpop.f32.mrf.mxu0 }
 0x54d   : > { %v1414_v18 = vadd.f32 %v2428_v7, %v1413_v16  ;;  %v1465_v20 = vmax.f32 %v1419_v15, 0.0  ;;  %v3381_v16 = vpop.permute.xlu0 %1788 }
 0x54f   : > { %v1464_v50 = vmax.f32 %v1414_v18, 0.0 }
 0x551   : > { %2826 = vmatprep.mubr.msk.f32.mxu1 %vm3552_vm4, %v1464_v50 }
 0x552   : > { %2827 = vmatmul.mubr.msk.f32.gmra.mxu1 %vm3552_vm4, %v1465_v20 }
 0x556   : > { %v2805_v21 = vpop.f32.mrf.mxu0 }
 0x557   : > { %v1429_v22 = vadd.f32 %v2805_v21, %v2428_v7  ;;  %v3387_v21 = vpop.permute.xlu1 %1800 }
 0x558   : > { %v1423_v23 = vpop.f32.mrf.mxu0 }
 0x559   : > { %v1424_v24 = vadd.f32 %v2428_v7, %v1423_v23  ;;  %v1467_v26 = vmax.f32 %v1429_v22, 0.0  ;;  %v1798_v22 = vpop.permute.xlu0 %1797 }
 0x55b   : > { %v1466_v25 = vmax.f32 %v1424_v24, 0.0 }
 0x55d   : > { %2829 = vmatprep.mubr.msk.f32.mxu1 %vm3552_vm4, %v1466_v25 }
 0x55e   : > { %2830 = vmatmul.mubr.msk.f32.gmra.mxu1 %vm3552_vm4, %v1467_v26 }
 0x562   : > { %v2808_v28 = vpop.f32.mrf.mxu0 }
 0x563   : > { %v1439_v29 = vadd.f32 %v2808_v28, %v2428_v7 }
 0x564   : > { %v1433_v31 = vpop.f32.mrf.mxu0 }
 0x565   : > { %v1434_v54 = vadd.f32 %v2428_v7, %v1433_v31  ;;  %v1469_v33 = vmax.f32 %v1439_v29, 0.0 }
 0x567   : > { %v1468_v32 = vmax.f32 %v1434_v54, 0.0 }
 0x569   : > { %2832 = vmatprep.mubr.msk.f32.mxu1 %vm3552_vm4, %v1468_v32 }
 0x56a   : > { %2833 = vmatmul.mubr.msk.f32.gmra.mxu1 %vm3552_vm4, %v1469_v33 }
 0x56e   : > { %v2811_v34 = vpop.f32.mrf.mxu0 }
 0x56f   : > { %v1449_v35 = vadd.f32 %v2811_v34, %v2428_v7 }
 0x570   : > { %v1443_v58 = vpop.f32.mrf.mxu0 }
 0x571   : > { %v1444_v36 = vadd.f32 %v2428_v7, %v1443_v58  ;;  %v1471_v39 = vmax.f32 %v1449_v35, 0.0 }
 0x573   : > { %v1470_v37 = vmax.f32 %v1444_v36, 0.0  ;;  %v1804_v36 = vpop.permute.xlu1 %1803 }
 0x575   : > { %2835 = vmatprep.mubr.msk.f32.mxu1 %vm3552_vm4, %v1470_v37 }
 0x576   : > { %2836 = vmatmul.mubr.msk.f32.gmra.mxu1 %vm3552_vm4, %v1471_v39 }
 0x578   : > { %v2814_v40 = vpop.f32.mrf.mxu0 }
 0x579   : > { %v1459_v41 = vadd.f32 %v2814_v40, %v2428_v7 }
 0x57a   : > { %v1453_v19 = vpop.f32.mrf.mxu0 }
 0x57b   : > { %v1454_v43 = vadd.f32 %v2428_v7, %v1453_v19  ;;  %v1473_v45 = vmax.f32 %v1459_v41, 0.0 }
 0x57d   : > { %v1472_v44 = vmax.f32 %v1454_v43, 0.0 }
 0x57f   : > { %2838 = vmatprep.mubr.msk.f32.mxu1 %vm3552_vm4, %v1472_v44 }
 0x580   : > { %2839 = vmatmul.mubr.msk.f32.gmra.mxu1 %vm3552_vm4, %v1473_v45  ;;  %vm1814_vm4 = vcmp.eq.s32.totalorder %v1798_v22, 1 }
 0x581   : > { %2887 = vmatprep.mubr.msk.f32.mxu1 %vm3553_vm0, %v2954_v0  ;;  %vm1809_vm0 = vcmp.eq.s32.totalorder %v1783_v12, 1 }
 0x606   : > { %v2825_v3 = vpop.f32.mrf.mxu1 }
 0x607   : > { %v1591_v18 = vadd.f32 %v2825_v3, %v3379_v14 }
 0x608   : > { %v1585_v6 = vpop.f32.mrf.mxu1 }
 0x609   : > { %v1586_v50 = vadd.f32 %v3379_v14, %v1585_v6  ;;  %v1729_v23 = vsel %vm1717_vm10, %v1591_v18, -3e+38  ;;  %v1818_v24 = vsel %vm1806_vm11, %v1591_v18, -3e+38  ;;  %vm1725_vm10 = vcmp.eq.s32.totalorder %v3370_v4, 1 }
 0x60a   : > { %vm1811_vm11 = vcmp.eq.s32.totalorder %v3381_v16, 1  ;;  %v3405_v33 = vsel %vm944_vm6, %v1729_v23, -inf  ;;  %v3408_v34 = vsel %vm944_vm6, %v1818_v24, -inf }
 0x60b   : > { %v1728_v26 = vsel %vm1716_vm7, %v1586_v50, -3e+38  ;;  %v1817_v28 = vsel %vm1805_vm15, %v1586_v50, -3e+38  ;;  %vm1813_vm7 = vcmp.eq.s32.totalorder %v3376_v42, 1  ;;  %vm1727_vm15 = vcmp.eq.s32.totalorder %v3372_v5, 1 }
 0x60c   : > { %v1740_v37 = vsel %vm944_vm6, %v1728_v26, -inf  ;;  %v1829_v39 = vsel %vm944_vm6, %v1817_v28, -inf }
 0x612   : > { %v2828_v7 = vpop.f32.mrf.mxu1 }
 0x613   : > { %v1601_v25 = vadd.f32 %v2828_v7, %v3379_v14 }
 0x614   : > { %v1595_v11 = vpop.f32.mrf.mxu1 }
 0x615   : > { %v1596_v29 = vadd.f32 %v3379_v14, %v1595_v11  ;;  %v1731_v40 = vsel %vm1719_vm8, %v1601_v25, -3e+38  ;;  %v1820_v41 = vsel %vm1808_vm3, %v1601_v25, -3e+38  ;;  %vm1816_vm8 = vcmp.eq.s32.totalorder %v1804_v36, 1 }
 0x616   : > { %v1743_v52 = vsel %vm944_vm6, %v1731_v40, -inf  ;;  %v1832_v9 = vsel %vm944_vm6, %v1820_v41, -inf  ;;  %vm1867_vm3 = vcmask 1045504  }
 0x617   : > { %v1730_v19 = vsel %vm1718_vm13, %v1596_v29, -3e+38  ;;  %v1819_v43 = vsel %vm1807_vm2, %v1596_v29, -3e+38  ;;  %vm3556_vm13 = vcmp.eq.s32.totalorder %v3362_v62, 1  ;;  %vm3557_vm2 = vcmp.eq.s32.totalorder %v3368_v38, 1 }
 0x618   : > { %v1742_v53 = vsel %vm944_vm6, %v1730_v19, -inf  ;;  %v1831_v17 = vsel %vm944_vm6, %v1819_v43, -inf }
 0x61e   : > { %v2831_v13 = vpop.f32.mrf.mxu1 }
 0x61f   : > { %v1611_v31 = vadd.f32 %v2831_v13, %v3379_v14 }
 0x620   : > { %v1605_v15 = vpop.f32.mrf.mxu1 }
 0x621   : > { %v1606_v32 = vadd.f32 %v3379_v14, %v1605_v15  ;;  %v1733_v44 = vsel %vm1721_vm9, %v1611_v31, -3e+38  ;;  %v1822_v60 = vsel %vm1810_vm5, %v1611_v31, -3e+38  ;;  %vm1815_vm9 = vcmp.eq.s32.totalorder %v3387_v21, 1 }
 0x622   : > { %v1746_v56 = vsel %vm944_vm6, %v1733_v44, -inf  ;;  %v1835_v57 = vsel %vm944_vm6, %v1822_v60, -inf  ;;  %vm3558_vm5 = vcmask 1043456  }
 0x623   : > { %v1732_v46 = vsel %vm1720_vm14, %v1606_v32, -3e+38  ;;  %v1821_v27 = vsel %vm1809_vm0, %v1606_v32, -3e+38  ;;  %vm1726_vm0 = vcmp.eq.s32.totalorder %v3374_v8, 1  ;;  %v1747_v3 = vmax.f32 %v3405_v33, %v1746_v56 }
 0x624   : > { %v1744_v59 = vsel %vm944_vm6, %v1732_v46, -inf  ;;  %v1833_v30 = vsel %vm944_vm6, %v1821_v27, -inf  ;;  %v1836_v11 = vmax.f32 %v3408_v34, %v1835_v57  ;;  %vm1865_vm14 = vcmask 1044480  }
 0x625   : > { %v1745_v12 = vmax.f32 %v1740_v37, %v1744_v59  ;;  %v1834_v13 = vmax.f32 %v1829_v39, %v1833_v30 }
 0x62a   : > { %v2834_v20 = vpop.f32.mrf.mxu1 }
 0x62b   : > { %v1621_v35 = vadd.f32 %v2834_v20, %v3379_v14 }
 0x62c   : > { %v1615_v54 = vpop.f32.mrf.mxu1 }
 0x62d   : > { %v1616_v47 = vadd.f32 %v3379_v14, %v1615_v54  ;;  %v1735_v48 = vsel %vm3556_vm13, %v1621_v35, -3e+38  ;;  %v1824_v49 = vsel %vm3557_vm2, %v1621_v35, -3e+38 }
 0x62e   : > { %v1750_v61 = vsel %vm944_vm6, %v1735_v48, -inf  ;;  %v1839_v62 = vsel %vm944_vm6, %v1824_v49, -inf }
 0x62f   : > { %v1734_v63 = vsel %vm1722_vm1, %v1616_v47, -3e+38  ;;  %v1823_v38 = vsel %vm1811_vm11, %v1616_v47, -3e+38  ;;  %v1751_v16 = vmax.f32 %v1743_v52, %v1750_v61  ;;  %v1840_v20 = vmax.f32 %v1832_v9, %v1839_v62 }
 0x630   : > { %v1748_v18 = vsel %vm944_vm6, %v1734_v63, -inf  ;;  %v1837_v50 = vsel %vm944_vm6, %v1823_v38, -inf  ;;  %vm1858_vm1 = vcmask 1040384   ;;  %v1961_v38 = vld [vmem:[%s2991_s11 + $0x298] sm:$0xff]  ;;  %vm3559_vm11 = vmmov 0  }
 0x631   : > { %v1749_v29 = vmax.f32 %v1742_v53, %v1748_v18  ;;  %v1838_v31 = vmax.f32 %v1831_v17, %v1837_v50  ;;  %v2043_v18 = vld [vmem:[%s2991_s11 + $0x2b0] sm:$0xff]  ;;  %v2454_v50 = vld [vmem:[%s2991_s11 + $0x278] ss:$0 sm:$0xff] }
 0x636   : > { %v2837_v58 = vpop.f32.mrf.mxu1 }
 0x637   : > { %v1631_v51 = vadd.f32 %v2837_v58, %v3379_v14 }
 0x638   : > { %v1625_v45 = vpop.f32.mrf.mxu1 }
 0x639   : > { %v1626_v1 = vadd.f32 %v3379_v14, %v1625_v45  ;;  %v1737_v6 = vsel %vm1725_vm10, %v1631_v51, -3e+38  ;;  %v1826_v55 = vsel %vm1814_vm4, %v1631_v51, -3e+38  ;;  %vm1860_vm4 = vcmask 1041408  }
 0x63a   : > { %v1754_v2 = vsel %vm944_vm6, %v1737_v6, -inf  ;;  %v1843_v25 = vsel %vm944_vm6, %v1826_v55, -inf  ;;  %vm1869_vm10 = vcmask 1046528   ;;  %v1960_v6 = vld [vmem:[%s2991_s11 + $0x290] sm:$0xff]  ;;  %v2046_v55 = vld [vmem:[%s2991_s11 + $0x2c8] sm:$0xff] }
 0x63b   : > { %v1736_v7 = vsel %vm1724_vm12, %v1626_v1, -3e+38  ;;  %v1825_v10 = vsel %vm1813_vm7, %v1626_v1, -3e+38  ;;  %v1755_v5 = vmax.f32 %v1747_v3, %v1754_v2  ;;  %v1844_v37 = vmax.f32 %v1836_v11, %v1843_v25  ;;  %v2049_v11 = vld [vmem:[%s2991_s11 + $0x2e0] sm:$0xff] }
 0x63c   : > { %v1752_v42 = vsel %vm944_vm6, %v1736_v7, -inf  ;;  %v1841_v23 = vsel %vm944_vm6, %v1825_v10, -inf  ;;  %vm1862_vm12 = vcmask 1042432   ;;  %v1959_v7 = vld [vmem:[%s2991_s11 + $0x288] sm:$0xff]  ;;  %v1958_v10 = vld [vmem:[%s2991_s11 + $0x280] sm:$0xff]  ;;  %2872 = vmatpush3.msra.mxu1 %v2049_v11  ;;  %vm3560_vm7 = vcmask 261120  }
 0x63d   : > { %v1753_v33 = vmax.f32 %v1745_v12, %v1752_v42  ;;  %v1842_v34 = vmax.f32 %v1834_v13, %v1841_v23  ;;  %v2048_v12 = vld [vmem:[%s2991_s11 + $0x2d8] sm:$0xff]  ;;  %2873 = vmatprep.subr.mxu1 %v2954_v0  ;;  %v2047_v13 = vld [vmem:[%s2991_s11 + $0x2d0] sm:$0xff]  ;;  %v2042_v23 = vld [vmem:[%s2991_s11 + $0x2a8] sm:$0xff] }
 0x63e   : > { %2874 = vmatpush3.msra.mxu1 %v2048_v12 }
 0x63f   : > { %v1760_v43 = vmax.f32 %v1753_v33, %v1755_v5  ;;  %v1849_v44 = vmax.f32 %v1842_v34, %v1844_v37  ;;  %2875 = vmatprep.subr.mxu1 %v2954_v0  ;;  %v2458_v33 = vld [vmem:[%s2991_s11 + $0x2e8] ss:$0 sm:$0xff]  ;;  %v2220_v37 = vld [vmem:[%s2991_s11 + $0x350] sm:$0xff] }
 0x640   : > { %v2840_v15 = vpop.f32.mrf.mxu1  ;;  %2876 = vmatpush3.msra.mxu1 %v2047_v13 }
 0x641   : > { %v1641_v4 = vadd.f32 %v2840_v15, %v3379_v14  ;;  %2877 = vmatprep.subr.mxu1 %v2954_v0  ;;  %v2045_v15 = vld [vmem:[%s2991_s11 + $0x2c0] sm:$0xff] }
 0x642   : > { %v1635_v24 = vpop.f32.mrf.mxu1  ;;  %2878 = vmatpush3.msra.mxu1 %v2046_v55 }
 0x643   : > { %v1739_v22 = vsel %vm1727_vm15, %v1641_v4, -3e+38  ;;  %v1828_v26 = vsel %vm1816_vm8, %v1641_v4, -3e+38  ;;  %v1636_v28 = vadd.f32 %v3379_v14, %v1635_v24  ;;  %2879 = vmatprep.subr.mxu1 %v2954_v0  ;;  %v2132_v24 = vld [vmem:[%s2991_s11 + $0x308] sm:$0xff]  ;;  %vm3561_vm15 = vmmov %vm3560_vm7 }
 0x644   : > { %v1758_v54 = vsel %vm944_vm6, %v1739_v22, -inf  ;;  %v1847_v32 = vsel %vm944_vm6, %v1828_v26, -inf  ;;  %2880 = vmatpush3.msra.mxu1 %v2045_v15  ;;  %v2457_v22 = vld [vmem:[%s2991_s11 + $0x2a0] ss:$0 sm:$0xff] }
 0x645   : > { %v1738_v35 = vsel %vm1726_vm0, %v1636_v28, -3e+38  ;;  %v1827_v58 = vsel %vm1815_vm9, %v1636_v28, -3e+38  ;;  %v1759_v39 = vmax.f32 %v1751_v16, %v1758_v54  ;;  %v1848_v40 = vmax.f32 %v1840_v20, %v1847_v32  ;;  %v2044_v16 = vld [vmem:[%s2991_s11 + $0x2b8] sm:$0xff]  ;;  %2881 = vmatprep.subr.mxu1 %v2954_v0  ;;  %v2129_v32 = vld [vmem:[%s2991_s11 + $0x2f0] sm:$0xff] }
 0x646   : > { %v1756_v36 = vsel %vm944_vm6, %v1738_v35, -inf  ;;  %v1845_v14 = vsel %vm944_vm6, %v1827_v58, -inf  ;;  %2882 = vmatpush3.msra.mxu1 %v2044_v16  ;;  %v2130_v54 = vld [vmem:[%s2991_s11 + $0x2f8] sm:$0xff] }
 0x647   : > { %v1757_v41 = vmax.f32 %v1749_v29, %v1756_v36  ;;  %v1846_v19 = vmax.f32 %v1838_v31, %v1845_v14  ;;  %2883 = vmatprep.subr.mxu1 %v2954_v0  ;;  %v2131_v31 = vld [vmem:[%s2991_s11 + $0x300] sm:$0xff]  ;;  %v2219_v36 = vld [vmem:[%s2991_s11 + $0x348] sm:$0xff] }
 0x648   : > { %2884 = vmatpush3.msra.mxu1 %v2043_v18  ;;  %v2218_v14 = vld [vmem:[%s2991_s11 + $0x340] sm:$0xff] }
 0x649   : > { %v1761_v45 = vmax.f32 %v1757_v41, %v1759_v39  ;;  %v1850_v60 = vmax.f32 %v1846_v19, %v1848_v40  ;;  %2885 = vmatprep.subr.mxu1 %v2954_v0  ;;  %v2217_v39 = vld [vmem:[%s2991_s11 + $0x338] sm:$0xff]  ;;  %v2216_v40 = vld [vmem:[%s2991_s11 + $0x330] sm:$0xff]  ;;  %v2215_v41 = vld [vmem:[%s2991_s11 + $0x328] sm:$0xff] }
 0x64a   : > { %2886 = vmatpush3.msra.mxu1 %v2042_v23  ;;  %v2214_v19 = vld [vmem:[%s2991_s11 + $0x320] sm:$0xff] }
 0x64b   : > { %v1762_v46 = vmax.f32 %v1760_v43, %v1761_v45  ;;  %v1851_v8 = vmax.f32 %v1849_v44, %v1850_v60  ;;  %v2213_v43 = vld [vmem:[%s2991_s11 + $0x318] sm:$0xff]  ;;  %v2461_v45 = vld [vmem:[%s2991_s11 + $0x310] ss:$0 sm:$0xff] }
 0x64d   : > { %v1763_v27 = vrot.slane %v1762_v46, 4  ;;  %v1852_v47 = vrot.slane %v1851_v8, 4 }
 0x64f   : > { %v1764_v21 = vmax.f32 %v1762_v46, %v1763_v27  ;;  %v1853_v48 = vmax.f32 %v1851_v8, %v1852_v47  ;;  %v2462_v27 = vld [vmem:[%s2991_s11 + $0x358] ss:$0 sm:$0xff] }
 0x651   : > { %v1765_v49 = vrot.slane %v1764_v21, 2  ;;  %v1854_v51 = vrot.slane %v1853_v48, 2 }
 0x653   : > { %v1766_v1 = vmax.f32 %v1764_v21, %v1765_v49  ;;  %v1855_v52 = vmax.f32 %v1853_v48, %v1854_v51 }
 0x655   : > { %v1767_v9 = vrot.slane %v1766_v1, 1  ;;  %v1856_v53 = vrot.slane %v1855_v52, 1 }
 0x657   : > { %v1768_v56 = vmax.f32 %v1766_v1, %v1767_v9  ;;  %v1857_v17 = vmax.f32 %v1855_v52, %v1856_v53 }
 0x659   : > { %v1859_v57 = vsel %vm1858_vm1, %v1768_v56, %v1857_v17 }
 0x65a   : > { %v1861_v59 = vsel %vm1860_vm4, %v1859_v57, 0.0 }
 0x65b   : > { %v1863_v30 = vsel %vm1862_vm12, %v1861_v59, 0.0 }
 0x65c   : > { %v1864_v61 = vsel %vm3558_vm5, %v1863_v30, 0.0 }
 0x65d   : > { %v1866_v62 = vsel %vm1865_vm14, %v1864_v61, 0.0 }
 0x65e   : > { %v1868_v63 = vsel %vm1867_vm3, %v1866_v62, 0.0 }
 0x65f   : > { %v1870_v3 = vsel %vm1869_vm10, %v1868_v63, 0.0 }
 0x660   : > { %2858 = vmatmul.mubr.msk.f32.vlgmr.msra.gmra.mxu0 %vm944_vm6, %v1870_v3 }
 0x661   : > { %2861 = vmatpush3.msra.mxu0 %v1961_v38  ;;  %2868 = vmatprep.mubr.msk.f32.mxu0 %vm3559_vm11, %v2954_v0 }
 0x662   : > { %2862 = vmatprep.subr.mxu0 %v2954_v0 }
 0x663   : > { %2863 = vmatpush3.msra.mxu0 %v1960_v6 }
 0x664   : > { %2864 = vmatprep.subr.mxu0 %v2954_v0 }
 0x665   : > { %2865 = vmatpush3.msra.mxu0 %v1959_v7 }
 0x666   : > { %2866 = vmatprep.subr.mxu0 %v2954_v0 }
 0x667   : > { %2867 = vmatpush3.msra.mxu0 %v1958_v10 }
 0x668   : > { %2890 = vmatprep.subr.mxu0 %v2954_v0 }
 0x720   : > { %v1953_v4 = vpop.f32.mrf.mxu0 }
 0x721   : > { %v1954_v20 = vadd.f32 %v2454_v50, %v1953_v4 }
 0x722   : > { %v2859_v2 = vpop.f32.mrf.mxu0 }
 0x723   : > { %v1957_v42 = vmax.f32 %v1954_v20, 0.0 }
 0x725   : > { %2869 = vmatmul.mubr.msk.f32.vlgmr.msra.gmra.mxu0 %vm3560_vm7, %v1957_v42 }
 0x726   : > { %2898 = vmatprep.mubr.msk.f32.mxu0 %vm3559_vm11, %v2954_v0  ;;  %2891 = vmatpush3.msra.mxu0 %v2132_v24 }
 0x727   : > { %2892 = vmatprep.subr.mxu0 %v2954_v0 }
 0x728   : > { %2893 = vmatpush3.msra.mxu0 %v2131_v31 }
 0x729   : > { %2894 = vmatprep.subr.mxu0 %v2954_v0 }
 0x72a   : > { %2895 = vmatpush3.msra.mxu0 %v2130_v54 }
 0x72b   : > { %2896 = vmatprep.subr.mxu0 %v2954_v0 }
 0x72c   : > { %2897 = vmatpush3.msra.mxu0 %v2129_v32 }
 0x72d   : > { %2901 = vmatprep.subr.mxu0 %v2954_v0 }
 0x7e5   : > { %v2031_v25 = vpop.f32.mrf.mxu0 }
 0x7e6   : > { %v2035_v26 = vadd.f32 %v2031_v25, %v1870_v3 }
 0x7e7   : > { %v2870_v28 = vpop.f32.mrf.mxu0 }
 0x7e8   : > { %v2041_v29 = vadd.f32 %v2457_v22, %v2035_v26 }
 0x7ea   : > { %2888 = vmatmul.mubr.msk.f32.vlgmr.msra.gmra.mxu1 %vm944_vm6, %v2041_v29 }
 0x8aa   : > { %v2124_v34 = vpop.f32.mrf.mxu1 }
 0x8ab   : > { %v2125_v35 = vadd.f32 %v2458_v33, %v2124_v34 }
 0x8ac   : > { %v2889_v58 = vpop.f32.mrf.mxu1 }
 0x8ad   : > { %v2128_v5 = vmax.f32 %v2125_v35, 0.0 }
 0x8af   : > { %2899 = vmatmul.mubr.msk.f32.vlgmr.msra.gmra.mxu0 %vm3561_vm15, %v2128_v5 }
 0x8b0   : > { %2902 = vmatpush3.msra.mxu0 %v2220_v37  ;;  %2917 = vmatprep.mubr.msk.f32.mxu0 %vm3559_vm11, %v2954_v0 }
 0x8b1   : > { %2903 = vmatprep.subr.mxu0 %v2954_v0 }
 0x8b2   : > { %2904 = vmatpush3.msra.mxu0 %v2219_v36 }
 0x8b3   : > { %2905 = vmatprep.subr.mxu0 %v2954_v0 }
 0x8b4   : > { %2906 = vmatpush3.msra.mxu0 %v2218_v14 }
 0x8b5   : > { %2907 = vmatprep.subr.mxu0 %v2954_v0 }
 0x8b6   : > { %2908 = vmatpush3.msra.mxu0 %v2217_v39 }
 0x8b7   : > { %2909 = vmatprep.subr.mxu0 %v2954_v0 }
 0x8b8   : > { %2910 = vmatpush3.msra.mxu0 %v2216_v40 }
 0x8b9   : > { %2911 = vmatprep.subr.mxu0 %v2954_v0 }
 0x8ba   : > { %2912 = vmatpush3.msra.mxu0 %v2215_v41 }
 0x8bb   : > { %2913 = vmatprep.subr.mxu0 %v2954_v0 }
 0x8bc   : > { %2914 = vmatpush3.msra.mxu0 %v2214_v19 }
 0x8bd   : > { %2915 = vmatprep.subr.mxu0 %v2954_v0 }
 0x8be   : > { %2916 = vmatpush3.msra.mxu0 %v2213_v43 }
 0x96f   : > { %v2202_v44 = vpop.f32.mrf.mxu0 }
 0x970   : > { %v2206_v60 = vadd.f32 %v2202_v44, %v2041_v29 }
 0x971   : > { %v2900_v46 = vpop.f32.mrf.mxu0 }
 0x972   : > { %v2212_v8 = vadd.f32 %v2461_v45, %v2206_v60 }
 0x974   : > { %2918 = vmatmul.mubr.msk.f32.vlgmr.msra.gmra.mxu0 %vm944_vm6, %v2212_v8 }
 0xa34   : > { %v2295_v47 = vpop.f32.mrf.mxu0 }
 0xa35   : > { %v2296_v21 = vadd.f32 %v2462_v27, %v2295_v47 }
 0xa36   : > { %v2919_v48 = vpop.f32.mrf.mxu0 }
 0xa37   : > { %2299 = vst [vmem:[%s114_s18] sm:$0xff] %v2296_v21 }
 0xa38 PF: > { %s11_s6 = sadd.s32 1, %s2952_s6  }
 0xa39   : > { %p8_p4 = scmp.ge.s32.totalorder %s11_s6, 4  }
 0xa3b   :  { %10 = sbr.rel (!%p8_p4) target bundleno = 1 (0x1), region = 54 }

</bundles_post_ra>
